<compile_context>
chip_gen: v7x
topology: tpu7x:2x2x1
jax: 0.10.0
libtpu: 0.0.40
codegen_flags: <defaults>
</compile_context>

<pallas_src>
import jax
import jax.numpy as jnp
from jax.experimental import pallas as pl
from jax.experimental.pallas import tpu as pltpu

L = 30              # sequence length expected by fc1 (32 * 30 = 960)
C_IN = 3
C_OUT = 32
N_CLASSES = 3
LANE = 128          # TPU lane width; fc1 output padded to one full lane group
FLAT_IN = C_IN * L      # 90
FLAT_HID = C_OUT * L    # 960

_BUFFERED_OK = True     # flipped to False once if pl.Buffered(1) is rejected


def net_kernel(x_ref, w1_ref, b1_ref, w2_ref, b2_ref, o_ref):
    # x_ref : (TN, 90)    bf16  flattened NCL rows (contiguous reshape, no transpose)
    # w1_ref: (90, 960)   bf16  kron(conv_w.T, I_L): conv(k=1)+flatten in one matmul
    # b1_ref: (1, 960)    f32   conv bias repeated per position
    # w2_ref: (960, 128)  bf16  fc1 weight, transposed, zero-padded 3 -> 128 lanes
    # b2_ref: (1, 128)    f32   fc1 bias, zero-padded
    # o_ref : (TN, 128)   f32   lane-dense padded output (columns 0..2 are real)
    h = jnp.dot(x_ref[...], w1_ref[...], preferred_element_type=jnp.float32)
    h = jnp.maximum(h + b1_ref[...], 0.0)       # bias + ReLU in f32 on the VPU
    h16 = h.astype(jnp.bfloat16)                # bf16 operand for the 2nd MXU pass
    o_ref[...] = (
        jnp.dot(h16, w2_ref[...], preferred_element_type=jnp.float32) + b2_ref[...]
    )


def prepare_params(w_conv, b_conv, w_fc1, b_fc1):
    """One-time packing of the PyTorch parameters (hoisted off the per-call path)."""
    assert w_conv.shape == (C_OUT, C_IN, 1)
    assert w_fc1.shape == (N_CLASSES, FLAT_HID)
    # Conv1d(k=1) folded with the c-major flatten:
    #   W1[c*L + i, o*L + j] = w_conv[o, c, 0] * (i == j)
    w1 = jnp.kron(
        jnp.transpose(w_conv[:, :, 0]).astype(jnp.float32),
        jnp.eye(L, dtype=jnp.float32),
    ).astype(jnp.bfloat16)                                        # (90, 960)
    b1 = jnp.repeat(b_conv.astype(jnp.float32), L).reshape(1, FLAT_HID)
    # fc1 transposed and zero-padded to 128 output lanes (lane-dense stores).
    w2 = (
        jnp.zeros((FLAT_HID, LANE), jnp.float32)
        .at[:, :N_CLASSES]
        .set(jnp.transpose(w_fc1).astype(jnp.float32))
    ).astype(jnp.bfloat16)                                        # (960, 128)
    b2 = jnp.zeros((1, LANE), jnp.float32).at[0, :N_CLASSES].set(
        b_fc1.astype(jnp.float32)
    )
    return w1, b1, w2, b2


def _choose_tile(n, block_n):
    """Row tile: multiple of 8, capped at block_n, and >= 2 tiles once n >= 16
    so v7x's two TensorCores both get work (neutral on v5e/v6e)."""
    if n < 16:
        return n
    num_tiles = max(2, 2 * ((n + 2 * block_n - 1) // (2 * block_n)))
    tn = (((n + num_tiles - 1) // num_tiles) + 7) // 8 * 8
    return min(block_n, tn)


def _pallas_forward(x_flat, params, tn, buffered):
    w1, b1, w2, b2 = params
    n = x_flat.shape[0]
    grid = ((n + tn - 1) // tn,)

    res_kw = {"pipeline_mode": pl.Buffered(1)} if buffered else {}

    def resident(shape):
        # Constant index_map -> block never changes; single-buffer it.
        return pl.BlockSpec(shape, lambda i: (0, 0), **res_kw)

    flops = 2 * n * (FLAT_IN * FLAT_HID + FLAT_HID * LANE)
    bytes_accessed = (
        n * FLAT_IN * 2                 # x (bf16)
        + n * LANE * 4                  # padded output (f32)
        + FLAT_IN * FLAT_HID * 2        # w1 (bf16)
        + FLAT_HID * 4                  # b1 (f32)
        + FLAT_HID * LANE * 2           # w2 (bf16)
        + LANE * 4                      # b2 (f32)
    )

    return pl.pallas_call(
        net_kernel,
        out_shape=jax.ShapeDtypeStruct((n, LANE), jnp.float32),
        grid_spec=pltpu.PrefetchScalarGridSpec(
            num_scalar_prefetch=0,
            grid=grid,
            in_specs=[
                pl.BlockSpec((tn, FLAT_IN), lambda i: (i, 0)),   # x tile
                resident((FLAT_IN, FLAT_HID)),                   # w1
                resident((1, FLAT_HID)),                         # b1
                resident((FLAT_HID, LANE)),                      # w2
                resident((1, LANE)),                             # b2
            ],
            out_specs=pl.BlockSpec((tn, LANE), lambda i: (i, 0)),
        ),
        compiler_params=pltpu.CompilerParams(
            dimension_semantics=("parallel",),   # batch tiles across TCs on v7x
        ),
        cost_estimate=pl.CostEstimate(
            flops=flops, transcendentals=0, bytes_accessed=bytes_accessed
        ),
    )(x_flat, w1, b1, w2, b2)


def net_forward(x_ncl, params, *, block_n=1024, padded_output=False):
    """x_ncl: (N, 3, 30) (PyTorch NCL layout). Returns (N, 3) f32 logits,
    or the lane-dense padded (N, 128) array if padded_output=True."""
    global _BUFFERED_OK
    n = x_ncl.shape[0]
    assert x_ncl.shape[1:] == (C_IN, L)

    # Contiguous reshape only (index c*L + l, no transpose), then a single cast
    # to bf16 for native-rate MXU operands (no separate f32 HBM pass).
    x_flat = x_ncl.reshape(n, FLAT_IN).astype(jnp.bfloat16)

    tn = _choose_tile(n, block_n)

    out_pad = None
    if _BUFFERED_OK:
        try:
            out_pad = _pallas_forward(x_flat, params, tn, buffered=True)
        except Exception:
            _BUFFERED_OK = False     # Buffered(1) unsupported on this build
    if out_pad is None:
        out_pad = _pallas_forward(x_flat, params, tn, buffered=False)

    if padded_output:
        return out_pad               # columns 3..127 are exactly zero
    return out_pad[:, :N_CLASSES]


def reference_forward(x_ncl, w_conv, b_conv, w_fc1, b_fc1):
    """Pure-JAX f32 replica of the PyTorch forward for verification."""
    hi = jax.lax.Precision.HIGHEST
    conv = (
        jnp.einsum("ncl,oc->nol", x_ncl, w_conv[:, :, 0], precision=hi)
        + b_conv[None, :, None]
    )
    conv = jnp.maximum(conv, 0.0)                 # ReLU; MaxPool1d(1,1) == identity
    flat = conv.reshape(conv.shape[0], -1)        # (N, 960), c-major flatten
    return jnp.dot(flat, w_fc1.T, precision=hi) + b_fc1[None, :]


if __name__ == "__main__":
    key = jax.random.PRNGKey(0)
    kx, k1, k2, k3, k4, kx2 = jax.random.split(key, 6)

    # Deterministic synthetic parameters (xavier-uniform-ish bounds).
    w_conv = jax.random.uniform(
        k1, (C_OUT, C_IN, 1), jnp.float32,
        -((6.0 / (C_IN + C_OUT)) ** 0.5), (6.0 / (C_IN + C_OUT)) ** 0.5)
    b_conv = jax.random.uniform(k2, (C_OUT,), jnp.float32, -0.1, 0.1)
    bound2 = (6.0 / (FLAT_HID + N_CLASSES)) ** 0.5
    w_fc1 = jax.random.uniform(k3, (N_CLASSES, FLAT_HID), jnp.float32, -bound2, bound2)
    b_fc1 = jax.random.uniform(k4, (N_CLASSES,), jnp.float32, -0.1, 0.1)

    params = prepare_params(w_conv, b_conv, w_fc1, b_fc1)     # hoisted, done once

    # Small batch (single tile), sliced (N, 3) output.
    n_small = 2
    x = jax.random.normal(kx, (n_small, C_IN, L), dtype=jnp.float32)
    out = jax.block_until_ready(net_forward(x, params))
    ref = reference_forward(x, w_conv, b_conv, w_fc1, b_fc1)
    assert out.shape == (n_small, N_CLASSES)
    assert jnp.allclose(out, ref, atol=2e-2, rtol=2e-2), (out, ref)

    # Padded output path (no extra HBM slice); pad columns must be exactly zero.
    out_pad = jax.block_until_ready(net_forward(x, params, padded_output=True))
    assert out_pad.shape == (n_small, LANE)
    assert jnp.allclose(out_pad[:, :N_CLASSES], ref, atol=2e-2, rtol=2e-2)
    assert bool(jnp.all(out_pad[:, N_CLASSES:] == 0.0))

    # Larger batch: >= 2 grid tiles (v7x megacore) + edge-masked remainder tile.
    n_big = 1000
    xb = jax.random.normal(kx2, (n_big, C_IN, L), dtype=jnp.float32)
    out_b = jax.block_until_ready(net_forward(xb, params))
    ref_b = reference_forward(xb, w_conv, b_conv, w_fc1, b_fc1)
    assert out_b.shape == (n_big, N_CLASSES)
    assert jnp.allclose(out_b, ref_b, atol=2e-2, rtol=2e-2), "batched mismatch"

    print("KERNEL_OK")
</pallas_src>

<mosaic_0001>
module attributes {stable_mosaic.version = 11 : i64} {
  func.func @net_kernel(%arg0: i32, %arg1: memref<2x90xbf16, #tpu.memory_space<vmem>>, %arg2: memref<90x960xbf16, #tpu.memory_space<vmem>>, %arg3: memref<1x960xf32, #tpu.memory_space<vmem>>, %arg4: memref<960x128xbf16, #tpu.memory_space<vmem>>, %arg5: memref<1x128xf32, #tpu.memory_space<vmem>>, %arg6: memref<2x128xf32, #tpu.memory_space<vmem>>) attributes {dimension_semantics = [#tpu.dimension_semantics<parallel>], iteration_bounds = array<i64: 1>, scalar_prefetch = 0 : i64, scratch_operands = 0 : i64, tpu.core_type = #tpu.core_type<tc>, window_params = [{transform_indices = @transform_0, window_bounds = array<i64: 2, 90>}, {pipeline_mode = #tpu.pipeline_mode<synchronous>, transform_indices = @transform_1, window_bounds = array<i64: 90, 960>}, {pipeline_mode = #tpu.pipeline_mode<synchronous>, transform_indices = @transform_2, window_bounds = array<i64: 1, 960>}, {pipeline_mode = #tpu.pipeline_mode<synchronous>, transform_indices = @transform_3, window_bounds = array<i64: 960, 128>}, {pipeline_mode = #tpu.pipeline_mode<synchronous>, transform_indices = @transform_4, window_bounds = array<i64: 1, 128>}, {transform_indices = @transform_5, window_bounds = array<i64: 2, 128>}]} {
    %c0 = arith.constant 0 : index
    %c0_0 = arith.constant 0 : index
    %0 = vector.load %arg1[%c0, %c0_0] : memref<2x90xbf16, #tpu.memory_space<vmem>>, vector<2x90xbf16>
    %c0_1 = arith.constant 0 : index
    %c0_2 = arith.constant 0 : index
    %1 = vector.load %arg2[%c0_1, %c0_2] : memref<90x960xbf16, #tpu.memory_space<vmem>>, vector<90x960xbf16>
    %cst = arith.constant dense<0.000000e+00> : vector<2x960xf32>
    %2 = tpu.matmul %0, %1, %cst {dimension_numbers = #tpu.dot_dimension_numbers<[1], [0], [0], [1], [0, 0, 1, 1], [], []>} : vector<2x90xbf16>, vector<90x960xbf16>, vector<2x960xf32> -> vector<2x960xf32>
    %c0_3 = arith.constant 0 : index
    %c0_4 = arith.constant 0 : index
    %3 = vector.load %arg3[%c0_3, %c0_4] : memref<1x960xf32, #tpu.memory_space<vmem>>, vector<1x960xf32>
    %4 = vector.broadcast %3 : vector<1x960xf32> to vector<2x960xf32>
    %5 = arith.addf %2, %4 : vector<2x960xf32>
    %cst_5 = arith.constant 0.000000e+00 : f32
    %6 = vector.broadcast %cst_5 : f32 to vector<2x960xf32>
    %7 = arith.maximumf %5, %6 : vector<2x960xf32>
    %8 = arith.truncf %7 : vector<2x960xf32> to vector<2x960xbf16>
    %c0_6 = arith.constant 0 : index
    %c0_7 = arith.constant 0 : index
    %9 = vector.load %arg4[%c0_6, %c0_7] : memref<960x128xbf16, #tpu.memory_space<vmem>>, vector<960x128xbf16>
    %cst_8 = arith.constant dense<0.000000e+00> : vector<2x128xf32>
    %10 = tpu.matmul %8, %9, %cst_8 {dimension_numbers = #tpu.dot_dimension_numbers<[1], [0], [0], [1], [0, 0, 1, 1], [], []>} : vector<2x960xbf16>, vector<960x128xbf16>, vector<2x128xf32> -> vector<2x128xf32>
    %c0_9 = arith.constant 0 : index
    %c0_10 = arith.constant 0 : index
    %11 = vector.load %arg5[%c0_9, %c0_10] : memref<1x128xf32, #tpu.memory_space<vmem>>, vector<1x128xf32>
    %12 = vector.broadcast %11 : vector<1x128xf32> to vector<2x128xf32>
    %13 = arith.addf %10, %12 : vector<2x128xf32>
    %c0_11 = arith.constant 0 : index
    %c0_12 = arith.constant 0 : index
    %14 = vector.load %arg6[%c0_11, %c0_12] : memref<2x128xf32, #tpu.memory_space<vmem>>, vector<2x128xf32>
    tpu.vector_store %arg6[%c0_11, %c0_12], %13 {strides = array<i32>} : memref<2x128xf32, #tpu.memory_space<vmem>>, vector<2x128xf32>,
    return
  }
  func.func @transform_0(%arg0: i32) -> (i32, i32) {
    %c0_i32 = arith.constant 0 : i32
    %c0_i32_0 = arith.constant 0 : i32
    return %arg0, %c0_i32 : i32, i32
  }
  func.func @transform_1(%arg0: i32) -> (i32, i32) {
    %c0_i32 = arith.constant 0 : i32
    %c0_i32_0 = arith.constant 0 : i32
    %c0_i32_1 = arith.constant 0 : i32
    return %c0_i32, %c0_i32_0 : i32, i32
  }
  func.func @transform_2(%arg0: i32) -> (i32, i32) {
    %c0_i32 = arith.constant 0 : i32
    %c0_i32_0 = arith.constant 0 : i32
    %c0_i32_1 = arith.constant 0 : i32
    return %c0_i32, %c0_i32_0 : i32, i32
  }
  func.func @transform_3(%arg0: i32) -> (i32, i32) {
    %c0_i32 = arith.constant 0 : i32
    %c0_i32_0 = arith.constant 0 : i32
    %c0_i32_1 = arith.constant 0 : i32
    return %c0_i32, %c0_i32_0 : i32, i32
  }
  func.func @transform_4(%arg0: i32) -> (i32, i32) {
    %c0_i32 = arith.constant 0 : i32
    %c0_i32_0 = arith.constant 0 : i32
    %c0_i32_1 = arith.constant 0 : i32
    return %c0_i32, %c0_i32_0 : i32, i32
  }
  func.func @transform_5(%arg0: i32) -> (i32, i32) {
    %c0_i32 = arith.constant 0 : i32
    %c0_i32_0 = arith.constant 0 : i32
    return %arg0, %c0_i32 : i32, i32
  }
}

module attributes {stable_mosaic.version = 11 : i64} {
  func.func @net_kernel(%arg0: i32, %arg1: memref<2x90xbf16, #tpu.memory_space<vmem>>, %arg2: memref<90x960xbf16, #tpu.memory_space<vmem>>, %arg3: memref<1x960xf32, #tpu.memory_space<vmem>>, %arg4: memref<960x128xbf16, #tpu.memory_space<vmem>>, %arg5: memref<1x128xf32, #tpu.memory_space<vmem>>, %arg6: memref<2x128xf32, #tpu.memory_space<vmem>>) attributes {dimension_semantics = [#tpu.dimension_semantics<parallel>], iteration_bounds = array<i64: 1>, scalar_prefetch = 0 : i64, scratch_operands = 0 : i64, tpu.core_type = #tpu.core_type<tc>, window_params = [{transform_indices = @transform_0, window_bounds = array<i64: 2, 90>}, {pipeline_mode = #tpu.pipeline_mode<synchronous>, transform_indices = @transform_1, window_bounds = array<i64: 90, 960>}, {pipeline_mode = #tpu.pipeline_mode<synchronous>, transform_indices = @transform_2, window_bounds = array<i64: 1, 960>}, {pipeline_mode = #tpu.pipeline_mode<synchronous>, transform_indices = @transform_3, window_bounds = array<i64: 960, 128>}, {pipeline_mode = #tpu.pipeline_mode<synchronous>, transform_indices = @transform_4, window_bounds = array<i64: 1, 128>}, {transform_indices = @transform_5, window_bounds = array<i64: 2, 128>}]} {
    %c0 = arith.constant 0 : index
    %c0_0 = arith.constant 0 : index
    %0 = vector.load %arg1[%c0, %c0_0] : memref<2x90xbf16, #tpu.memory_space<vmem>>, vector<2x90xbf16>
    %c0_1 = arith.constant 0 : index
    %c0_2 = arith.constant 0 : index
    %1 = vector.load %arg2[%c0_1, %c0_2] : memref<90x960xbf16, #tpu.memory_space<vmem>>, vector<90x960xbf16>
    %cst = arith.constant dense<0.000000e+00> : vector<2x960xf32>
    %2 = tpu.matmul %0, %1, %cst {dimension_numbers = #tpu.dot_dimension_numbers<[1], [0], [0], [1], [0, 0, 1, 1], [], []>} : vector<2x90xbf16>, vector<90x960xbf16>, vector<2x960xf32> -> vector<2x960xf32>
    %c0_3 = arith.constant 0 : index
    %c0_4 = arith.constant 0 : index
    %3 = vector.load %arg3[%c0_3, %c0_4] : memref<1x960xf32, #tpu.memory_space<vmem>>, vector<1x960xf32>
    %4 = vector.broadcast %3 : vector<1x960xf32> to vector<2x960xf32>
    %5 = arith.addf %2, %4 : vector<2x960xf32>
    %cst_5 = arith.constant 0.000000e+00 : f32
    %6 = vector.broadcast %cst_5 : f32 to vector<2x960xf32>
    %7 = arith.maximumf %5, %6 : vector<2x960xf32>
    %8 = arith.truncf %7 : vector<2x960xf32> to vector<2x960xbf16>
    %c0_6 = arith.constant 0 : index
    %c0_7 = arith.constant 0 : index
    %9 = vector.load %arg4[%c0_6, %c0_7] : memref<960x128xbf16, #tpu.memory_space<vmem>>, vector<960x128xbf16>
    %cst_8 = arith.constant dense<0.000000e+00> : vector<2x128xf32>
    %10 = tpu.matmul %8, %9, %cst_8 {dimension_numbers = #tpu.dot_dimension_numbers<[1], [0], [0], [1], [0, 0, 1, 1], [], []>} : vector<2x960xbf16>, vector<960x128xbf16>, vector<2x128xf32> -> vector<2x128xf32>
    %c0_9 = arith.constant 0 : index
    %c0_10 = arith.constant 0 : index
    %11 = vector.load %arg5[%c0_9, %c0_10] : memref<1x128xf32, #tpu.memory_space<vmem>>, vector<1x128xf32>
    %12 = vector.broadcast %11 : vector<1x128xf32> to vector<2x128xf32>
    %13 = arith.addf %10, %12 : vector<2x128xf32>
    %c0_11 = arith.constant 0 : index
    %c0_12 = arith.constant 0 : index
    %14 = vector.load %arg6[%c0_11, %c0_12] : memref<2x128xf32, #tpu.memory_space<vmem>>, vector<2x128xf32>
    tpu.vector_store %arg6[%c0_11, %c0_12], %13 {strides = array<i32>} : memref<2x128xf32, #tpu.memory_space<vmem>>, vector<2x128xf32>,
    return
  }
  func.func @transform_0(%arg0: i32) -> (i32, i32) {
    %c0_i32 = arith.constant 0 : i32
    %c0_i32_0 = arith.constant 0 : i32
    return %arg0, %c0_i32 : i32, i32
  }
  func.func @transform_1(%arg0: i32) -> (i32, i32) {
    %c0_i32 = arith.constant 0 : i32
    %c0_i32_0 = arith.constant 0 : i32
    %c0_i32_1 = arith.constant 0 : i32
    return %c0_i32, %c0_i32_0 : i32, i32
  }
  func.func @transform_2(%arg0: i32) -> (i32, i32) {
    %c0_i32 = arith.constant 0 : i32
    %c0_i32_0 = arith.constant 0 : i32
    %c0_i32_1 = arith.constant 0 : i32
    return %c0_i32, %c0_i32_0 : i32, i32
  }
  func.func @transform_3(%arg0: i32) -> (i32, i32) {
    %c0_i32 = arith.constant 0 : i32
    %c0_i32_0 = arith.constant 0 : i32
    %c0_i32_1 = arith.constant 0 : i32
    return %c0_i32, %c0_i32_0 : i32, i32
  }
  func.func @transform_4(%arg0: i32) -> (i32, i32) {
    %c0_i32 = arith.constant 0 : i32
    %c0_i32_0 = arith.constant 0 : i32
    %c0_i32_1 = arith.constant 0 : i32
    return %c0_i32, %c0_i32_0 : i32, i32
  }
  func.func @transform_5(%arg0: i32) -> (i32, i32) {
    %c0_i32 = arith.constant 0 : i32
    %c0_i32_0 = arith.constant 0 : i32
    return %arg0, %c0_i32 : i32, i32
  }
}

</mosaic_0001>

<bundles_post_ra>
// kernel: tpu_custom_call.1
= control target key start
LH: loop header
LB: loop body
LE: loop exit
PB: predicated region body
PF: predicated region fallthrough
CT: control target
= control target key end

     0   :  { %10 = vsyncpa [#allocation3], 0  ;;  %s1803_s0 = inlined_call_operand.hbm [shape: bf16[2,90], index: 0, kind: input, shape index: {}]   ;;  %s1804_s1 = inlined_call_operand.hbm [shape: bf16[90,960], index: 1, kind: input, shape index: {}]   ;;  %s1805_s2 = inlined_call_operand.hbm [shape: f32[1,960], index: 2, kind: input, shape index: {}]   ;;  %s1806_s3 = inlined_call_operand.hbm [shape: bf16[960,128], index: 3, kind: input, shape index: {}]   ;;  %s1807_s4 = inlined_call_operand.vmem [shape: f32[1,128], index: 4, kind: input, shape index: {}]   ;;  %s1808_s5 = inlined_call_operand.hbm [shape: f32[2,128], index: 5, kind: output, shape index: {}]  }
   0x1   :  { %11 = vsyncpa [#allocation6], 0 }
   0x2   :  { %12 = vsyncpa [#allocation9], 0 }
   0x3   :  { %13 = vsyncpa [#allocation4], 0  ;;  %s1646_s18 = smov [#allocation5]   ;;  %s1528_s22 = scalar_lea.hbm %s1804_s1, 6144 }
   0x4   :  { %s29_s19 = sshll.u32 %s1646_s18, 4  ;;  %p1529_p0 = scmp.ne.s32.totalorder %s1804_s1, %s1528_s22  ;;  %s30_s19 = int_to_ptr.vmem [resolvable:$true] %s29_s19 }
   0x5   :  { %p1532_p1 = scmp.lt.u32.totalorder %s1528_s22, %s1804_s1 }
   0x7   :  { %p1534_p2 = pnand %p1532_p1, %p1529_p0 }
   0x9   :  { %1537 = shalt.err (!%p1534_p2)
}
   0xa   :  { %s1538_s27 = scalar_lea.vmem %s30_s19, 6144  ;;  %p1543_p4 = scmp.lt.s32.totalorder %s30_s19, %s30_s19 }
   0xb   :  { %p1539_p3 = scmp.ne.s32.totalorder %s30_s19, %s1538_s27  ;;  %p1544_p5 = scmp.lt.s32.totalorder %s1538_s27, %s1538_s27 }
   0xd   :  { %p1545_p6 = por %p1544_p5, %p1543_p4 }
   0xf   :  { %p1546_p7 = pnand %p1545_p6, %p1539_p3 }
  0x11   :  { %1549 = shalt.err (!%p1546_p7)
}
  0x12   :  { %s1647_s28 = smov 512   ;;  %s1648_s29 = smov 32  }
  0x13   :  { %35 = dma.hbm_to_vmem [thread:$0]  %s1804_s1, 6144, %s30_s19, [#allocation6], %s1647_s28, %s1647_s28, %s1648_s29  }
  0x14   :  { %s1649_s7 = smov [#allocation2]   ;;  %s1650_s9 = smov [#allocation7]  }
  0x15   :  { %s20_s8 = sshll.u32 %s1649_s7, 4  ;;  %s42_s10 = sshll.u32 %s1650_s9, 4  ;;  %s21_s8 = int_to_ptr.vmem [resolvable:$true] %s20_s8  ;;  %s43_s10 = int_to_ptr.vmem [resolvable:$true] %s42_s10 }
  0x16   :  { %s1550_s13 = scalar_lea.hbm %s1803_s0, 16 }
  0x17   :  { %p1551_p8 = scmp.ne.s32.totalorder %s1803_s0, %s1550_s13  ;;  %p1554_p9 = scmp.lt.u32.totalorder %s1550_s13, %s1803_s0 }
  0x19   :  { %p1556_p10 = pnand %p1554_p9, %p1551_p8 }
  0x1b   :  { %1559 = shalt.err (!%p1556_p10)
}
  0x1c   :  { %s1560_s1 = scalar_lea.vmem %s21_s8, 16  ;;  %s1564_s18 = scalar_lea.vmem %s21_s8, 32 }
  0x1d   :  { %p1561_p11 = scmp.ne.s32.totalorder %s21_s8, %s1560_s1  ;;  %p1565_p12 = scmp.lt.s32.totalorder %s21_s8, %s21_s8 }
  0x1e   :  { %p1566_p13 = scmp.lt.s32.totalorder %s1564_s18, %s1560_s1 }
  0x20   :  { %p1567_p0 = por %p1566_p13, %p1565_p12 }
  0x22   :  { %p1568_p1 = pnand %p1567_p0, %p1561_p11 }
  0x24   :  { %1571 = shalt.err (!%p1568_p1)
}
  0x25   :  { %23 = dma.hbm_to_vmem [thread:$0]  %s1803_s0, 16, %s21_s8, [#allocation3]  }
  0x26   :  { %s1572_s23 = scalar_lea.hbm %s1805_s2, 128 }
  0x27   :  { %p1573_p2 = scmp.ne.s32.totalorder %s1805_s2, %s1572_s23  ;;  %p1576_p3 = scmp.lt.u32.totalorder %s1572_s23, %s1805_s2 }
  0x29   :  { %p1578_p4 = pnand %p1576_p3, %p1573_p2 }
  0x2b   :  { %1581 = shalt.err (!%p1578_p4)
}
  0x2c   :  { %s1582_s28 = scalar_lea.vmem %s43_s10, 128  ;;  %p1587_p6 = scmp.lt.s32.totalorder %s43_s10, %s43_s10 }
  0x2d   :  { %p1583_p5 = scmp.ne.s32.totalorder %s43_s10, %s1582_s28  ;;  %p1588_p7 = scmp.lt.s32.totalorder %s1582_s28, %s1582_s28 }
  0x2f   :  { %p1589_p8 = por %p1588_p7, %p1587_p6 }
  0x31   :  { %p1590_p9 = pnand %p1589_p8, %p1583_p5 }
  0x33   :  { %1593 = shalt.err (!%p1590_p9)
}
  0x34   :  { %45 = dma.hbm_to_vmem [thread:$0]  %s1805_s2, 128, %s43_s10, [#allocation6]  }
  0x35   :  { %s1651_s30 = smov [#allocation8]   ;;  %s1594_s9 = scalar_lea.hbm %s1806_s3, 7680 }
  0x36   :  { %s51_s6 = sshll.u32 %s1651_s30, 4  ;;  %p1595_p10 = scmp.ne.s32.totalorder %s1806_s3, %s1594_s9  ;;  %s52_s6 = int_to_ptr.vmem [resolvable:$true] %s51_s6 }
  0x37   :  { %p1598_p11 = scmp.lt.u32.totalorder %s1594_s9, %s1806_s3 }
  0x39   :  { %p1600_p12 = pnand %p1598_p11, %p1595_p10 }
  0x3b   :  { %1603 = shalt.err (!%p1600_p12)
}
  0x3c   :  { %s1604_s15 = scalar_lea.vmem %s52_s6, 7680  ;;  %p1609_p0 = scmp.lt.s32.totalorder %s52_s6, %s52_s6 }
  0x3d   :  { %p1605_p13 = scmp.ne.s32.totalorder %s52_s6, %s1604_s15  ;;  %p1610_p1 = scmp.lt.s32.totalorder %s1604_s15, %s1604_s15 }
  0x3f   :  { %p1611_p2 = por %p1610_p1, %p1609_p0 }
  0x41   :  { %p1612_p3 = pnand %p1611_p2, %p1605_p13 }
  0x43   :  { %1615 = shalt.err (!%p1612_p3)
}
  0x44   :  { %s1652_s2 = smov 64   ;;  %s1653_s10 = smov 4  }
  0x45   :  { %57 = dma.hbm_to_vmem [thread:$0]  %s1806_s3, 7680, %s52_s6, [#allocation9], %s1652_s2, %s1652_s2, %s1653_s10  }
  0x46   :  { %1638 = dma.done.wait [#allocation3], 16  }
  0x47   :  { %1639 = vsyncadd [#allocation3], 4294967280 }
  0x48   :  { %1640 = dma.done.wait [#allocation6], 6272  }
  0x49   :  { %1641 = vsyncadd [#allocation6], 4294961024 }
  0x4a   :  { %1642 = dma.done.wait [#allocation9], 7680  }
  0x4b   :  { %1643 = vsyncadd [#allocation9], 4294959616  ;;  %v1654_v0 = vmov 0   ;;  %v74_v1 = vld [vmem:[#allocation5] sm:$0xff]  ;;  %v75_v3 = vld [vmem:[#allocation5 + $0x8] sm:$0xff]  ;;  %vm400_vm0 = vcmask 1044480  }
  0x4c   :  { %457 = vmatprep.mubr.bf16.mxu0 %v1654_v0  ;;  %498 = vmatprep.mubr.bf16.mxu1 %v1654_v0  ;;  %v78_v2 = vld [vmem:[#allocation5 + $0x20] sm:$0xff]  ;;  %v79_v5 = vld [vmem:[#allocation5 + $0x28] sm:$0xff]  ;;  %v76_v44 = vld [vmem:[#allocation5 + $0x10] sm:$0xff]  ;;  %vm396_vm1 = vcmask 736256   ;;  %vm1092_vm2 = vcmask 523264   ;;  %s1655_s18 = smov [#allocation10]  }
  0x4d   :  { %v1275_v4 = vcombine.high %v74_v1, %v78_v2  ;;  %v1274_v6 = vcombine.low %v74_v1, %v78_v2  ;;  %v82_v7 = vld [vmem:[#allocation5 + $0x40] sm:$0xff]  ;;  %v1277_v9 = vcombine.high %v75_v3, %v79_v5  ;;  %v1276_v10 = vcombine.low %v75_v3, %v79_v5  ;;  %v83_v12 = vld [vmem:[#allocation5 + $0x48] sm:$0xff]  ;;  %v80_v45 = vld [vmem:[#allocation5 + $0x30] sm:$0xff]  ;;  %s1263_s19 = sshll.u32 %s1655_s18, 4  ;;  %s1264_s19 = int_to_ptr.vmem [resolvable:$true] %s1263_s19 }
  0x4e   :  { %v86_v8 = vld [vmem:[#allocation5 + $0x60] sm:$0xff]  ;;  %v87_v13 = vld [vmem:[#allocation5 + $0x68] sm:$0xff]  ;;  %v77_v51 = vld [vmem:[#allocation5 + $0x18] sm:$0xff]  ;;  %v1279_v55 = vcombine.high %v76_v44, %v80_v45  ;;  %v1278_v62 = vcombine.low %v76_v44, %v80_v45  ;;  %p1621_p5 = scmp.lt.s32.totalorder %s1264_s19, %s1264_s19 }
  0x4f   :  { %v1283_v11 = vcombine.high %v82_v7, %v86_v8  ;;  %v90_v14 = vld [vmem:[#allocation5 + $0x80] sm:$0xff]  ;;  %425 = vmatprep.subr.bf16.mxu0 %v1275_v4  ;;  %v1285_v15 = vcombine.high %v83_v12, %v87_v13  ;;  %v91_v17 = vld [vmem:[#allocation5 + $0x88] sm:$0xff]  ;;  %466 = vmatprep.subr.bf16.mxu1 %v1277_v9  ;;  %v1282_v19 = vcombine.low %v82_v7, %v86_v8  ;;  %v81_v52 = vld [vmem:[#allocation5 + $0x38] sm:$0xff] }
  0x50   :  { %v94_v16 = vld [vmem:[#allocation5 + $0xa0] sm:$0xff]  ;;  %v95_v18 = vld [vmem:[#allocation5 + $0xa8] sm:$0xff]  ;;  %426 = vmatpush1.bf16.msra.mxu0 %v1274_v6  ;;  %467 = vmatpush1.bf16.msra.mxu1 %v1276_v10  ;;  %v1284_v20 = vcombine.low %v83_v12, %v87_v13  ;;  %v84_v53 = vld [vmem:[#allocation5 + $0x50] sm:$0xff]  ;;  %v1281_v59 = vcombine.high %v77_v51, %v81_v52  ;;  %v1280_v3 = vcombine.low %v77_v51, %v81_v52 }
  0x51   :  { %427 = vmatprep.subr.bf16.mxu0 %v1283_v11  ;;  %v1291_v21 = vcombine.high %v90_v14, %v94_v16  ;;  %468 = vmatprep.subr.bf16.mxu1 %v1285_v15  ;;  %v1293_v22 = vcombine.high %v91_v17, %v95_v18  ;;  %v98_v23 = vld [vmem:[#allocation5 + $0xc0] sm:$0xff]  ;;  %v99_v25 = vld [vmem:[#allocation5 + $0xc8] sm:$0xff]  ;;  %v1290_v27 = vcombine.low %v90_v14, %v94_v16  ;;  %v88_v56 = vld [vmem:[#allocation5 + $0x70] sm:$0xff] }
  0x52   :  { %v102_v24 = vld [vmem:[#allocation5 + $0xe0] sm:$0xff]  ;;  %v103_v26 = vld [vmem:[#allocation5 + $0xe8] sm:$0xff]  ;;  %v1292_v28 = vcombine.low %v91_v17, %v95_v18  ;;  %v1740_v58 = vld [vmem:[#allocation2] sm:$0x1]  ;;  %v1287_v1 = vcombine.high %v84_v53, %v88_v56  ;;  %v1286_v7 = vcombine.low %v84_v53, %v88_v56 }
  0x53   :  { %v1299_v29 = vcombine.high %v98_v23, %v102_v24  ;;  %v1301_v30 = vcombine.high %v99_v25, %v103_v26  ;;  %v106_v31 = vld [vmem:[#allocation5 + $0x100] sm:$0xff]  ;;  %v107_v33 = vld [vmem:[#allocation5 + $0x108] sm:$0xff]  ;;  %v1298_v35 = vcombine.low %v98_v23, %v102_v24  ;;  %v1300_v36 = vcombine.low %v99_v25, %v103_v26  ;;  %v85_v60 = vld [vmem:[#allocation5 + $0x58] sm:$0xff] }
  0x54   :  { %428 = vmatpush1.bf16.msra.mxu0 %v1282_v19  ;;  %469 = vmatpush1.bf16.msra.mxu1 %v1284_v20  ;;  %v110_v32 = vld [vmem:[#allocation5 + $0x120] sm:$0xff]  ;;  %v111_v34 = vld [vmem:[#allocation5 + $0x128] sm:$0xff]  ;;  %v89_v61 = vld [vmem:[#allocation5 + $0x78] sm:$0xff] }
  0x55   :  { %429 = vmatprep.subr.bf16.mxu0 %v1291_v21  ;;  %470 = vmatprep.subr.bf16.mxu1 %v1293_v22  ;;  %v1307_v37 = vcombine.high %v106_v31, %v110_v32  ;;  %v1309_v38 = vcombine.high %v107_v33, %v111_v34  ;;  %v114_v39 = vld [vmem:[#allocation5 + $0x140] sm:$0xff]  ;;  %v115_v41 = vld [vmem:[#allocation5 + $0x148] sm:$0xff]  ;;  %v1306_v43 = vcombine.low %v106_v31, %v110_v32  ;;  %v92_v63 = vld [vmem:[#allocation5 + $0x90] sm:$0xff] }
  0x56   :  { %v118_v40 = vld [vmem:[#allocation5 + $0x160] sm:$0x11]  ;;  %v119_v42 = vld [vmem:[#allocation5 + $0x168] sm:$0x11]  ;;  %v1308_v46 = vcombine.low %v107_v33, %v111_v34  ;;  %v96_v2 = vld [vmem:[#allocation5 + $0xb0] sm:$0xff]  ;;  %v1289_v4 = vcombine.high %v85_v60, %v89_v61  ;;  %v1288_v11 = vcombine.low %v85_v60, %v89_v61 }
  0x57   :  { %v1315_v47 = vcombine.high %v114_v39, %v118_v40  ;;  %v1314_v48 = vcombine.low %v114_v39, %v118_v40  ;;  %v1317_v49 = vcombine.high %v115_v41, %v119_v42  ;;  %v1316_v50 = vcombine.low %v115_v41, %v119_v42  ;;  %v93_v5 = vld [vmem:[#allocation5 + $0x98] sm:$0xff]  ;;  %v100_v8 = vld [vmem:[#allocation5 + $0xd0] sm:$0xff]  ;;  %v1468_v39 = vld [vmem:[#allocation8 + $0x40] sm:$0xff]  }
  0x58   :  { %430 = vmatpush1.bf16.msra.mxu0 %v1290_v27  ;;  %471 = vmatpush1.bf16.msra.mxu1 %v1292_v28  ;;  %v97_v6 = vld [vmem:[#allocation5 + $0xb8] sm:$0xff]  ;;  %v1295_v9 = vcombine.high %v92_v63, %v96_v2  ;;  %v104_v10 = vld [vmem:[#allocation5 + $0xf0] sm:$0xff]  ;;  %v1294_v17 = vcombine.low %v92_v63, %v96_v2  ;;  %v1469_v40 = vld [vmem:[#allocation8 + $0xc0] sm:$0xff]  }
  0x59   :  { %431 = vmatprep.subr.bf16.mxu0 %v1299_v29  ;;  %472 = vmatprep.subr.bf16.mxu1 %v1301_v30  ;;  %v402_v54 = vsel %vm400_vm0, %v1314_v48, 0  ;;  %v408_v57 = vsel %vm400_vm0, %v1316_v50, 0  ;;  %v1297_v12 = vcombine.high %v93_v5, %v97_v6  ;;  %v101_v13 = vld [vmem:[#allocation5 + $0xd8] sm:$0xff]  ;;  %v116_v14 = vld [vmem:[#allocation5 + $0x150] sm:$0xff]  ;;  %v1303_v21 = vcombine.high %v100_v8, %v104_v10  ;;  %v1470_v41 = vld [vmem:[#allocation8] sm:$0xff]  }
  0x5a   :  { %v120_v15 = vld [vmem:[#allocation5 + $0x170] sm:$0x11]  ;;  %v105_v16 = vld [vmem:[#allocation5 + $0xf8] sm:$0xff]  ;;  %v1296_v22 = vcombine.low %v93_v5, %v97_v6  ;;  %v1302_v27 = vcombine.low %v100_v8, %v104_v10  ;;  %v1471_v42 = vld [vmem:[#allocation8 + $0x80] sm:$0xff]  }
  0x5b   :  { %v108_v18 = vld [vmem:[#allocation5 + $0x110] sm:$0xff]  ;;  %v117_v20 = vld [vmem:[#allocation5 + $0x158] sm:$0xff]  ;;  %v1305_v24 = vcombine.high %v101_v13, %v105_v16  ;;  %v1318_v28 = vcombine.low %v116_v14, %v120_v15  ;;  %v1304_v31 = vcombine.low %v101_v13, %v105_v16  ;;  %v1480_v51 = vld [vmem:[#allocation8 + $0x58] sm:$0xff]  }
  0x5c   :  { %432 = vmatpush1.bf16.msra.mxu0 %v1298_v35  ;;  %473 = vmatpush1.bf16.msra.mxu1 %v1300_v36  ;;  %v112_v19 = vld [vmem:[#allocation5 + $0x130] sm:$0xff]  ;;  %v121_v23 = vld [vmem:[#allocation5 + $0x178] sm:$0x11]  ;;  %v1319_v36 = vcombine.high %v116_v14, %v120_v15  ;;  %v1481_v52 = vld [vmem:[#allocation8 + $0xd8] sm:$0xff]  }
  0x5d   :  { %433 = vmatprep.subr.bf16.mxu0 %v1307_v37  ;;  %474 = vmatprep.subr.bf16.mxu1 %v1309_v38  ;;  %v109_v25 = vld [vmem:[#allocation5 + $0x118] sm:$0xff]  ;;  %v1320_v29 = vcombine.low %v117_v20, %v121_v23  ;;  %v1311_v30 = vcombine.high %v108_v18, %v112_v19  ;;  %v1310_v33 = vcombine.low %v108_v18, %v112_v19  ;;  %v414_v34 = vsel %vm400_vm0, %v1318_v28, 0  ;;  %v1473_v44 = vld [vmem:[#allocation8 + $0xc8] sm:$0xff]   ;;  %v1482_v53 = vld [vmem:[#allocation8 + $0x18] sm:$0xff]  }
  0x5e   :  { %v113_v26 = vld [vmem:[#allocation5 + $0x138] sm:$0xff]  ;;  %v1321_v38 = vcombine.high %v117_v20, %v121_v23  ;;  %v1474_v45 = vld [vmem:[#allocation8 + $0x8] sm:$0xff]   ;;  %v1485_v56 = vld [vmem:[#allocation8 + $0xe0] sm:$0xff]  }
  0x5f   :  { %v1313_v32 = vcombine.high %v109_v25, %v113_v26  ;;  %v420_v35 = vsel %vm400_vm0, %v1320_v29, 0  ;;  %v1312_v37 = vcombine.low %v109_v25, %v113_v26  ;;  %v1477_v48 = vld [vmem:[#allocation8 + $0xd0] sm:$0xff]   ;;  %v1489_v60 = vld [vmem:[#allocation8 + $0xe8] sm:$0xff]   ;;  %v1497_v5 = vld [vmem:[#allocation8 + $0xf8] sm:$0xff]  }
  0x60   :  { %434 = vmatpush1.bf16.msra.mxu0 %v1306_v43  ;;  %475 = vmatpush1.bf16.msra.mxu1 %v1308_v46  ;;  %v1472_v43 = vld [vmem:[#allocation8 + $0x48] sm:$0xff]   ;;  %v1479_v50 = vld [vmem:[#allocation8 + $0x90] sm:$0xff]   ;;  %v1498_v6 = vld [vmem:[#allocation8 + $0x38] sm:$0xff]  }
  0x61   :  { %1322 = vmatprep.subr.msk.bf16.mxu0 %vm400_vm0, %v1315_v47  ;;  %1324 = vmatprep.subr.msk.bf16.mxu1 %vm400_vm0, %v1317_v49  ;;  %v1475_v46 = vld [vmem:[#allocation8 + $0x88] sm:$0xff]   ;;  %v1476_v47 = vld [vmem:[#allocation8 + $0x50] sm:$0xff]   ;;  %v1500_v8 = vld [vmem:[#allocation8 + $0x140] sm:$0xff]  }
  0x62   :  { %v1478_v49 = vld [vmem:[#allocation8 + $0x10] sm:$0xff]   ;;  %v1490_v61 = vld [vmem:[#allocation8 + $0x28] sm:$0xff]   ;;  %v1762_v14 = vld [vmem:[#allocation7] sm:$0xff] }
  0x63   :  { %v1492_v63 = vld [vmem:[#allocation8 + $0x70] sm:$0xff]  }
  0x64   :  { %436 = vmatpush1.bf16.msra.mxu0 %v402_v54  ;;  %477 = vmatpush1.bf16.msra.mxu1 %v408_v57  ;;  %v1483_v54 = vld [vmem:[#allocation8 + $0x98] sm:$0xff]   ;;  %v1486_v57 = vld [vmem:[#allocation8 + $0x20] sm:$0xff]   ;;  %v1494_v2 = vld [vmem:[#allocation8 + $0x30] sm:$0xff]  }
  0x65   :  { %507 = vmatprep.subr.bf16.mxu0 %v1279_v55  ;;  %548 = vmatprep.subr.bf16.mxu1 %v1281_v59  ;;  %v1484_v55 = vld [vmem:[#allocation8 + $0x60] sm:$0xff]   ;;  %v1488_v59 = vld [vmem:[#allocation8 + $0x68] sm:$0xff]  }
  0x67   :  { %1323 = vmatmul.mubr.msk.bf16.vlgmr.msra.gmra.mrb[0].mxu0 %vm396_vm1, %v1740_v58  ;;  %1325 = vmatmul.mubr.msk.bf16.vlgmr.msra.gmra.mrb[0].mxu1 %vm396_vm1, %v1740_v58 }
  0x68   :  { %508 = vmatpush1.bf16.msra.mxu0 %v1278_v62  ;;  %549 = vmatpush1.bf16.msra.mxu1 %v1280_v3  ;;  %v1491_v62 = vld [vmem:[#allocation8 + $0xa8] sm:$0xff]   ;;  %v1495_v3 = vld [vmem:[#allocation8 + $0xb0] sm:$0xff]  }
  0x69   :  { %509 = vmatprep.subr.bf16.mxu0 %v1287_v1  ;;  %550 = vmatprep.subr.bf16.mxu1 %v1289_v4  ;;  %v1493_v1 = vld [vmem:[#allocation8 + $0xf0] sm:$0xff]   ;;  %v1496_v4 = vld [vmem:[#allocation8 + $0x78] sm:$0xff]  }
  0x6a   :  { %539 = vmatprep.mubr.bf16.mxu0 %v1654_v0  ;;  %580 = vmatprep.mubr.bf16.mxu1 %v1654_v0 }
  0x6c   :  { %510 = vmatpush1.bf16.msra.mxu0 %v1286_v7  ;;  %551 = vmatpush1.bf16.msra.mxu1 %v1288_v11  ;;  %v1499_v7 = vld [vmem:[#allocation8 + $0xb8] sm:$0xff]  }
  0x6d   :  { %511 = vmatprep.subr.bf16.mxu0 %v1295_v9  ;;  %552 = vmatprep.subr.bf16.mxu1 %v1297_v12  ;;  %v124_v9 = vlaneseq }
  0x6f   :  { %v1757_v10 = vshrl.u32 %v124_v9, 7 }
  0x70   :  { %512 = vmatpush1.bf16.msra.mxu0 %v1294_v17  ;;  %553 = vmatpush1.bf16.msra.mxu1 %v1296_v22 }
  0x71   :  { %513 = vmatprep.subr.bf16.mxu0 %v1303_v21  ;;  %554 = vmatprep.subr.bf16.mxu1 %v1305_v24  ;;  %v126_v11 = vsub.s32 0, %v1757_v10  ;;  %v134_v12 = vsub.s32 2, %v1757_v10  ;;  %v130_v13 = vsub.s32 1, %v1757_v10  ;;  %v138_v15 = vsub.s32 3, %v1757_v10 }
  0x73   :  { %v127_v16 = vrot.slane %v1762_v14, %v126_v11  ;;  %v135_v17 = vrot.slane %v1762_v14, %v134_v12  ;;  %v131_v18 = vrot.slane %v1762_v14, %v130_v13  ;;  %v139_v19 = vrot.slane %v1762_v14, %v138_v15 }
  0x74   :  { %514 = vmatpush1.bf16.msra.mxu0 %v1302_v27  ;;  %555 = vmatpush1.bf16.msra.mxu1 %v1304_v31 }
  0x75   :  { %515 = vmatprep.subr.bf16.mxu0 %v1311_v30  ;;  %556 = vmatprep.subr.bf16.mxu1 %v1313_v32 }
  0x78   :  { %516 = vmatpush1.bf16.msra.mxu0 %v1310_v33  ;;  %557 = vmatpush1.bf16.msra.mxu1 %v1312_v37 }
  0x79   :  { %1326 = vmatprep.subr.msk.bf16.mxu0 %vm400_vm0, %v1319_v36  ;;  %1328 = vmatprep.subr.msk.bf16.mxu1 %vm400_vm0, %v1321_v38  ;;  %v1501_v38 = vld [vmem:[#allocation8 + $0x100] sm:$0xff]  }
  0x7c   :  { %518 = vmatpush1.bf16.msra.mxu0 %v414_v34  ;;  %559 = vmatpush1.bf16.msra.mxu1 %v420_v35 }
  0x7d   :  { %1392 = vmatprep.subr.bf16.mxu0 %v1468_v39  ;;  %1414 = vmatprep.subr.bf16.mxu1 %v1469_v40  ;;  %v1502_v40 = vld [vmem:[#allocation8 + $0x180] sm:$0xff]  }
  0x7f   :  { %1327 = vmatmul.mubr.msk.bf16.vlgmr.msra.gmra.mrb[4].mxu0 %vm396_vm1, %v1740_v58  ;;  %1329 = vmatmul.mubr.msk.bf16.vlgmr.msra.gmra.mrb[4].mxu1 %vm396_vm1, %v1740_v58  ;;  %v1487_v58 = vld [vmem:[#allocation8 + $0xa0] sm:$0xff]  }
  0x80   :  { %1393 = vmatpush3.bf16.msra.mxu0 %v1470_v41  ;;  %1415 = vmatpush3.bf16.msra.mxu1 %v1471_v42  ;;  %v1503_v41 = vld [vmem:[#allocation8 + $0x148] sm:$0xff]  }
  0x81   :  { %1394 = vmatprep.subr.bf16.mxu0 %v1472_v43  ;;  %1416 = vmatprep.subr.bf16.mxu1 %v1473_v44  ;;  %v1504_v43 = vld [vmem:[#allocation8 + $0x108] sm:$0xff]  }
  0x82   :  { %v1505_v44 = vld [vmem:[#allocation8 + $0x188] sm:$0xff]  }
  0x84   :  { %1395 = vmatpush3.bf16.msra.mxu0 %v1474_v45  ;;  %1417 = vmatpush3.bf16.msra.mxu1 %v1475_v46  ;;  %v1506_v45 = vld [vmem:[#allocation8 + $0x150] sm:$0xff]  }
  0x85   :  { %1396 = vmatprep.subr.bf16.mxu0 %v1476_v47  ;;  %1418 = vmatprep.subr.bf16.mxu1 %v1477_v48  ;;  %v1507_v46 = vld [vmem:[#allocation8 + $0x110] sm:$0xff]   ;;  %v1509_v48 = vld [vmem:[#allocation8 + $0x158] sm:$0xff]  }
  0x86   :  { %v1508_v47 = vld [vmem:[#allocation8 + $0x190] sm:$0xff]  }
  0x88   :  { %1397 = vmatpush3.bf16.msra.mxu0 %v1478_v49  ;;  %1419 = vmatpush3.bf16.msra.mxu1 %v1479_v50  ;;  %v1510_v49 = vld [vmem:[#allocation8 + $0x118] sm:$0xff]   ;;  %v146_v50 = vsub.s32 5, %v1757_v10 }
  0x89   :  { %1398 = vmatprep.subr.bf16.mxu0 %v1480_v51  ;;  %1420 = vmatprep.subr.bf16.mxu1 %v1481_v52  ;;  %v1511_v51 = vld [vmem:[#allocation8 + $0x198] sm:$0xff]   ;;  %v1512_v52 = vld [vmem:[#allocation8 + $0x160] sm:$0xff]  }
  0x8c   :  { %1399 = vmatpush3.bf16.msra.mxu0 %v1482_v53  ;;  %1421 = vmatpush3.bf16.msra.mxu1 %v1483_v54  ;;  %v154_v53 = vsub.s32 7, %v1757_v10  ;;  %v142_v54 = vsub.s32 4, %v1757_v10 }
  0x8d   :  { %1400 = vmatprep.subr.bf16.mxu0 %v1484_v55  ;;  %1422 = vmatprep.subr.bf16.mxu1 %v1485_v56  ;;  %v1513_v55 = vld [vmem:[#allocation8 + $0x120] sm:$0xff]   ;;  %v147_v56 = vrot.slane %v1762_v14, %v146_v50 }
  0x90   :  { %1401 = vmatpush3.bf16.msra.mxu0 %v1486_v57  ;;  %1423 = vmatpush3.bf16.msra.mxu1 %v1487_v58  ;;  %v1514_v57 = vld [vmem:[#allocation8 + $0x1a0] sm:$0xff]   ;;  %v1515_v58 = vld [vmem:[#allocation8 + $0x168] sm:$0xff]  }
  0x91   :  { %1402 = vmatprep.subr.bf16.mxu0 %v1488_v59  ;;  %1424 = vmatprep.subr.bf16.mxu1 %v1489_v60  ;;  %v155_v59 = vrot.slane %v1762_v14, %v154_v53 }
  0x94   :  { %1403 = vmatpush3.bf16.msra.mxu0 %v1490_v61  ;;  %1425 = vmatpush3.bf16.msra.mxu1 %v1491_v62  ;;  %v143_v61 = vrot.slane %v1762_v14, %v142_v54 }
  0x95   :  { %1404 = vmatprep.subr.bf16.mxu0 %v1492_v63  ;;  %1426 = vmatprep.subr.bf16.mxu1 %v1493_v1  ;;  %v1516_v1 = vld [vmem:[#allocation8 + $0x128] sm:$0xff]  }
  0x98   :  { %1405 = vmatpush3.bf16.msra.mxu0 %v1494_v2  ;;  %1427 = vmatpush3.bf16.msra.mxu1 %v1495_v3 }
  0x99   :  { %1406 = vmatprep.subr.bf16.mxu0 %v1496_v4  ;;  %1428 = vmatprep.subr.bf16.mxu1 %v1497_v5  ;;  %v1517_v5 = vld [vmem:[#allocation8 + $0x1a8] sm:$0xff]  }
  0x9c   :  { %1407 = vmatpush3.bf16.msra.mxu0 %v1498_v6  ;;  %1429 = vmatpush3.bf16.msra.mxu1 %v1499_v7  ;;  %v1518_v6 = vld [vmem:[#allocation8 + $0x170] sm:$0xff]  }
  0x9d   :  { %1216 = vmatprep.subr.bf16.mxu1 %v1654_v0  ;;  %1436 = vmatprep.subr.bf16.mxu0 %v1500_v8 }
 0x13a   :  { %v459_v20 = vpop.f32.mrb[0].mxu0  ;;  %v500_v22 = vpop.f32.mrb[0].mxu1 }
 0x13b   :  { %v460_v21 = vadd.f32 %v459_v20, %v127_v16  ;;  %v461_v23 = vpop.f32.mrb[1].mxu0  ;;  %v501_v24 = vadd.f32 %v500_v22, %v135_v17  ;;  %v502_v26 = vpop.f32.mrb[1].mxu1  ;;  %v1519_v17 = vld [vmem:[#allocation8 + $0x130] sm:$0xff]   ;;  %v1522_v22 = vld [vmem:[#allocation8 + $0x138] sm:$0xff]  }
 0x13c   :  { %v462_v25 = vadd.f32 %v461_v23, %v131_v18  ;;  %v463_v27 = vpop.f32.mrb[2].mxu0  ;;  %v503_v29 = vadd.f32 %v502_v26, %v139_v19  ;;  %v504_v30 = vpop.f32.mrb[2].mxu1  ;;  %v1520_v18 = vld [vmem:[#allocation8 + $0x1b0] sm:$0xff]   ;;  %v1521_v19 = vld [vmem:[#allocation8 + $0x178] sm:$0xff]   ;;  %v150_v26 = vsub.s32 6, %v1757_v10 }
 0x13d   :  { %v589_v28 = vmax.f32 %v460_v21, 0.0  ;;  %v464_v31 = vpop.f32.mrb[3].mxu0  ;;  %v591_v32 = vmax.f32 %v501_v24, 0.0  ;;  %v505_v34 = vpop.f32.mrb[3].mxu1  ;;  %v1523_v23 = vld [vmem:[#allocation8 + $0x1b8] sm:$0xff]   ;;  %v1525_v27 = vld [vmem:[#allocation8 + $0x1c8] sm:$0xff]  }
 0x13e   :  { %v590_v33 = vmax.f32 %v462_v25, 0.0  ;;  %v592_v36 = vmax.f32 %v503_v29, 0.0  ;;  %v1524_v25 = vld [vmem:[#allocation8 + $0x1c0] sm:$0xff]   ;;  %v1526_v29 = vld [vmem:[#allocation8 + $0x1d0] sm:$0xff]   ;;  %v1527_v31 = vld [vmem:[#allocation8 + $0x1d8] sm:$0xff]  }
 0x13f   :  { %v597_v35 = vpack.c.bf16 %v589_v28, %v589_v28  ;;  %v599_v42 = vpack.c.bf16 %v591_v32, %v591_v32  ;;  %v151_v28 = vrot.slane %v1762_v14, %v150_v26  ;;  %v1330_v14 = vld [vmem:[%s1807_s4] ss:$0 sm:$0xff]  ;;  %s1616_s4 = scalar_lea.vmem %s1264_s19, 32 }
 0x140   :  { %v598_v37 = vpack.c.bf16 %v590_v33, %v590_v33  ;;  %v600_v39 = vpack.c.bf16 %v592_v36, %v592_v36  ;;  %p1617_p4 = scmp.ne.s32.totalorder %s1264_s19, %s1616_s4  ;;  %p1622_p6 = scmp.lt.s32.totalorder %s1616_s4, %s1616_s4 }
 0x142   :  { %1128 = vmatprep.mubr.bf16.mxu0 %v598_v37  ;;  %1168 = vmatprep.mubr.bf16.mxu1 %v600_v39  ;;  %p1623_p7 = por %p1622_p6, %p1621_p5 }
 0x143   :  { %1129 = vmatmul.mubr.bf16.vlgmr.msra.gmra.mrb[8].mxu0 %v597_v35  ;;  %1169 = vmatmul.mubr.bf16.vlgmr.msra.gmra.mrb[8].mxu1 %v599_v42 }
 0x144   :  { %1437 = vmatpush3.bf16.msra.mxu0 %v1501_v38  ;;  %1217 = vmatpush1.bf16.msra.mxu1 %v1502_v40  ;;  %p1624_p8 = pnand %p1623_p7, %p1617_p4 }
 0x145   :  { %1438 = vmatprep.subr.bf16.mxu0 %v1503_v41  ;;  %1218 = vmatprep.subr.bf16.mxu1 %v1654_v0 }
 0x148   :  { %1439 = vmatpush3.bf16.msra.mxu0 %v1504_v43  ;;  %1219 = vmatpush1.bf16.msra.mxu1 %v1505_v44 }
 0x149   :  { %1440 = vmatprep.subr.bf16.mxu0 %v1506_v45  ;;  %1220 = vmatprep.subr.bf16.mxu1 %v1654_v0 }
 0x14c   :  { %1441 = vmatpush3.bf16.msra.mxu0 %v1507_v46  ;;  %1221 = vmatpush1.bf16.msra.mxu1 %v1508_v47 }
 0x14d   :  { %1442 = vmatprep.subr.bf16.mxu0 %v1509_v48  ;;  %1222 = vmatprep.subr.bf16.mxu1 %v1654_v0 }
 0x150   :  { %1443 = vmatpush3.bf16.msra.mxu0 %v1510_v49  ;;  %1223 = vmatpush1.bf16.msra.mxu1 %v1511_v51 }
 0x151   :  { %1444 = vmatprep.subr.bf16.mxu0 %v1512_v52  ;;  %1224 = vmatprep.subr.bf16.mxu1 %v1654_v0 }
 0x152   :  { %v541_v60 = vpop.f32.mrb[4].mxu0  ;;  %v582_v63 = vpop.f32.mrb[4].mxu1 }
 0x153   :  { %v543_v62 = vpop.f32.mrb[5].mxu0  ;;  %v584_v4 = vpop.f32.mrb[5].mxu1  ;;  %v542_v13 = vadd.f32 %v541_v60, %v143_v61  ;;  %v583_v30 = vadd.f32 %v582_v63, %v151_v28 }
 0x154   :  { %1445 = vmatpush3.bf16.msra.mxu0 %v1513_v55  ;;  %v544_v2 = vadd.f32 %v543_v62, %v147_v56  ;;  %v545_v3 = vpop.f32.mrb[6].mxu0  ;;  %1225 = vmatpush1.bf16.msra.mxu1 %v1514_v57  ;;  %v585_v8 = vadd.f32 %v584_v4, %v155_v59  ;;  %v586_v9 = vpop.f32.mrb[6].mxu1 }
 0x155   :  { %1446 = vmatprep.subr.bf16.mxu0 %v1515_v58  ;;  %v546_v7 = vpop.f32.mrb[7].mxu0  ;;  %1226 = vmatprep.subr.bf16.mxu1 %v1654_v0  ;;  %v587_v12 = vpop.f32.mrb[7].mxu1  ;;  %v593_v21 = vmax.f32 %v542_v13, 0.0  ;;  %v595_v32 = vmax.f32 %v583_v30, 0.0 }
 0x156   :  { %v594_v11 = vmax.f32 %v544_v2, 0.0  ;;  %v596_v15 = vmax.f32 %v585_v8, 0.0 }
 0x157   :  { %v601_v24 = vpack.c.bf16 %v593_v21, %v593_v21  ;;  %v603_v33 = vpack.c.bf16 %v595_v32, %v595_v32 }
 0x158   :  { %1447 = vmatpush3.bf16.msra.mxu0 %v1516_v1  ;;  %v602_v16 = vpack.c.bf16 %v594_v11, %v594_v11  ;;  %1227 = vmatpush1.bf16.msra.mxu1 %v1517_v5  ;;  %v604_v20 = vpack.c.bf16 %v596_v15, %v596_v15 }
 0x159   :  { %1448 = vmatprep.subr.bf16.mxu0 %v1518_v6  ;;  %1228 = vmatprep.subr.bf16.mxu1 %v1654_v0 }
 0x15a   :  { %1208 = vmatprep.mubr.bf16.mxu0 %v602_v16  ;;  %1391 = vmatprep.mubr.msk.bf16.mxu1 %vm1092_vm2, %v604_v20 }
 0x15c   :  { %1449 = vmatpush3.bf16.msra.mxu0 %v1519_v17  ;;  %1229 = vmatpush1.bf16.msra.mxu1 %v1520_v18 }
 0x15d   :  { %1450 = vmatprep.subr.bf16.mxu0 %v1521_v19  ;;  %1230 = vmatprep.subr.bf16.mxu1 %v1654_v0 }
 0x160   :  { %1451 = vmatpush3.bf16.msra.mxu0 %v1522_v22  ;;  %1231 = vmatpush1.bf16.msra.mxu1 %v1523_v23 }
 0x161   :  { %1232 = vmatprep.subr.bf16.mxu1 %v1654_v0 }
 0x163   :  { %1209 = vmatmul.mubr.bf16.vlgmr.msra.gmra.mrb[12].mxu0 %v601_v24 }
 0x164   :  { %1233 = vmatpush1.bf16.msra.mxu1 %v1524_v25 }
 0x165   :  { %1234 = vmatprep.subr.bf16.mxu1 %v1654_v0 }
 0x168   :  { %1235 = vmatpush1.bf16.msra.mxu1 %v1525_v27 }
 0x169   :  { %1236 = vmatprep.subr.bf16.mxu1 %v1654_v0 }
 0x16c   :  { %1237 = vmatpush1.bf16.msra.mxu1 %v1526_v29 }
 0x16d   :  { %1238 = vmatprep.subr.bf16.mxu1 %v1654_v0 }
 0x170   :  { %1239 = vmatpush1.bf16.msra.mxu1 %v1527_v31 }
 0x173   :  { %1249 = vmatmul.mubr.bf16.vlgmr.msra.gmra.mrb[12].mxu1 %v603_v33 }
 0x216   :  { %v1408_v10 = vpop.f32.mrb[8].mxu0  ;;  %v1430_v34 = vpop.f32.mrb[8].mxu1 }
 0x217   :  { %v1409_v35 = vpop.f32.mrb[9].mxu0  ;;  %v1431_v37 = vpop.f32.mrb[9].mxu1 }
 0x218   :  { %v1410_v36 = vadd.f32 %v1409_v35, %v1408_v10  ;;  %v1411_v38 = vpop.f32.mrb[10].mxu0  ;;  %v1432_v39 = vadd.f32 %v1431_v37, %v1430_v34  ;;  %v1433_v40 = vpop.f32.mrb[10].mxu1 }
 0x219   :  { %v1412_v41 = vpop.f32.mrb[11].mxu0  ;;  %v1434_v43 = vpop.f32.mrb[11].mxu1 }
 0x21a   :  { %v1131_v42 = vadd.f32 %v1410_v36, %v1330_v14 }
 0x21c   :  { %v1171_v44 = vadd.f32 %v1432_v39, %v1131_v42 }
 0x236   :  { %v1452_v0 = vpop.f32.mrb[12].mxu0 }
 0x237   :  { %v1453_v45 = vpop.f32.mrb[13].mxu0 }
 0x238   :  { %v1454_v46 = vadd.f32 %v1453_v45, %v1452_v0  ;;  %v1455_v47 = vpop.f32.mrb[14].mxu0 }
 0x239   :  { %v1456_v48 = vpop.f32.mrb[15].mxu0 }
 0x23a   :  { %v1211_v49 = vadd.f32 %v1454_v46, %v1171_v44 }
 0x246   :  { %v1250_v50 = vpop.f32.mrb[12].mxu1 }
 0x247   :  { %v1251_v51 = vadd.f32 %v1250_v50, %v1211_v49  ;;  %v1252_v52 = vpop.f32.mrb[13].mxu1 }
 0x248   :  { %v1253_v53 = vpop.f32.mrb[14].mxu1 }
 0x249   :  { %1256 = vst [vmem:[#allocation10] sm:$0x3] %v1251_v51  ;;  %v1254_v54 = vpop.f32.mrb[15].mxu1 }
 0x24a   :  { %1627 = shalt.err (!%p1624_p8)
}
 0x24b   :  { %s1628_s22 = scalar_lea.hbm %s1808_s5, 32 }
 0x24c   :  { %p1629_p9 = scmp.ne.s32.totalorder %s1808_s5, %s1628_s22  ;;  %p1632_p10 = scmp.lt.u32.totalorder %s1628_s22, %s1808_s5 }
 0x24e   :  { %p1634_p11 = pnand %p1632_p10, %p1629_p9 }
 0x250   :  { %1637 = shalt.err (!%p1634_p11)
}
 0x251   :  { %1266 = dma.vmem_to_hbm [thread:$0]  %s1264_s19, 32, %s1808_s5, [#allocation4]  }
 0x252   :  { %1644 = dma.done.wait [#allocation4], 32  }
 0x253   :  { %1645 = vsyncadd [#allocation4], 4294967264 }
 0x254   :  { %1270 = vsyncpa [#allocation3], 1 }
 0x255   :  { %1271 = vsyncpa [#allocation6], 1 }
 0x256   :  { %1272 = vsyncpa [#allocation9], 1 }
 0x257   :  { %1273 = vsyncpa [#allocation4], 1 }

// kernel: tpu_custom_call.1
= control target key start
LH: loop header
LB: loop body
LE: loop exit
PB: predicated region body
PF: predicated region fallthrough
CT: control target
= control target key end

     0   :  { %10 = vsyncpa [#allocation3], 0  ;;  %s1803_s0 = inlined_call_operand.hbm [shape: bf16[2,90], index: 0, kind: input, shape index: {}]   ;;  %s1804_s1 = inlined_call_operand.hbm [shape: bf16[90,960], index: 1, kind: input, shape index: {}]   ;;  %s1805_s2 = inlined_call_operand.hbm [shape: f32[1,960], index: 2, kind: input, shape index: {}]   ;;  %s1806_s3 = inlined_call_operand.hbm [shape: bf16[960,128], index: 3, kind: input, shape index: {}]   ;;  %s1807_s4 = inlined_call_operand.vmem [shape: f32[1,128], index: 4, kind: input, shape index: {}]   ;;  %s1808_s5 = inlined_call_operand.hbm [shape: f32[2,128], index: 5, kind: output, shape index: {}]  }
   0x1   :  { %11 = vsyncpa [#allocation6], 0 }
   0x2   :  { %12 = vsyncpa [#allocation9], 0 }
   0x3   :  { %13 = vsyncpa [#allocation4], 0  ;;  %s1646_s18 = smov [#allocation5]   ;;  %s1528_s22 = scalar_lea.hbm %s1804_s1, 6144 }
   0x4   :  { %s29_s19 = sshll.u32 %s1646_s18, 4  ;;  %p1529_p0 = scmp.ne.s32.totalorder %s1804_s1, %s1528_s22  ;;  %s30_s19 = int_to_ptr.vmem [resolvable:$true] %s29_s19 }
   0x5   :  { %p1532_p1 = scmp.lt.u32.totalorder %s1528_s22, %s1804_s1 }
   0x7   :  { %p1534_p2 = pnand %p1532_p1, %p1529_p0 }
   0x9   :  { %1537 = shalt.err (!%p1534_p2)
}
   0xa   :  { %s1538_s27 = scalar_lea.vmem %s30_s19, 6144  ;;  %p1543_p4 = scmp.lt.s32.totalorder %s30_s19, %s30_s19 }
   0xb   :  { %p1539_p3 = scmp.ne.s32.totalorder %s30_s19, %s1538_s27  ;;  %p1544_p5 = scmp.lt.s32.totalorder %s1538_s27, %s1538_s27 }
   0xd   :  { %p1545_p6 = por %p1544_p5, %p1543_p4 }
   0xf   :  { %p1546_p7 = pnand %p1545_p6, %p1539_p3 }
  0x11   :  { %1549 = shalt.err (!%p1546_p7)
}
  0x12   :  { %s1647_s28 = smov 512   ;;  %s1648_s29 = smov 32  }
  0x13   :  { %35 = dma.hbm_to_vmem [thread:$0]  %s1804_s1, 6144, %s30_s19, [#allocation6], %s1647_s28, %s1647_s28, %s1648_s29  }
  0x14   :  { %s1649_s7 = smov [#allocation2]   ;;  %s1650_s9 = smov [#allocation7]  }
  0x15   :  { %s20_s8 = sshll.u32 %s1649_s7, 4  ;;  %s42_s10 = sshll.u32 %s1650_s9, 4  ;;  %s21_s8 = int_to_ptr.vmem [resolvable:$true] %s20_s8  ;;  %s43_s10 = int_to_ptr.vmem [resolvable:$true] %s42_s10 }
  0x16   :  { %s1550_s13 = scalar_lea.hbm %s1803_s0, 16 }
  0x17   :  { %p1551_p8 = scmp.ne.s32.totalorder %s1803_s0, %s1550_s13  ;;  %p1554_p9 = scmp.lt.u32.totalorder %s1550_s13, %s1803_s0 }
  0x19   :  { %p1556_p10 = pnand %p1554_p9, %p1551_p8 }
  0x1b   :  { %1559 = shalt.err (!%p1556_p10)
}
  0x1c   :  { %s1560_s1 = scalar_lea.vmem %s21_s8, 16  ;;  %s1564_s18 = scalar_lea.vmem %s21_s8, 32 }
  0x1d   :  { %p1561_p11 = scmp.ne.s32.totalorder %s21_s8, %s1560_s1  ;;  %p1565_p12 = scmp.lt.s32.totalorder %s21_s8, %s21_s8 }
  0x1e   :  { %p1566_p13 = scmp.lt.s32.totalorder %s1564_s18, %s1560_s1 }
  0x20   :  { %p1567_p0 = por %p1566_p13, %p1565_p12 }
  0x22   :  { %p1568_p1 = pnand %p1567_p0, %p1561_p11 }
  0x24   :  { %1571 = shalt.err (!%p1568_p1)
}
  0x25   :  { %23 = dma.hbm_to_vmem [thread:$0]  %s1803_s0, 16, %s21_s8, [#allocation3]  }
  0x26   :  { %s1572_s23 = scalar_lea.hbm %s1805_s2, 128 }
  0x27   :  { %p1573_p2 = scmp.ne.s32.totalorder %s1805_s2, %s1572_s23  ;;  %p1576_p3 = scmp.lt.u32.totalorder %s1572_s23, %s1805_s2 }
  0x29   :  { %p1578_p4 = pnand %p1576_p3, %p1573_p2 }
  0x2b   :  { %1581 = shalt.err (!%p1578_p4)
}
  0x2c   :  { %s1582_s28 = scalar_lea.vmem %s43_s10, 128  ;;  %p1587_p6 = scmp.lt.s32.totalorder %s43_s10, %s43_s10 }
  0x2d   :  { %p1583_p5 = scmp.ne.s32.totalorder %s43_s10, %s1582_s28  ;;  %p1588_p7 = scmp.lt.s32.totalorder %s1582_s28, %s1582_s28 }
  0x2f   :  { %p1589_p8 = por %p1588_p7, %p1587_p6 }
  0x31   :  { %p1590_p9 = pnand %p1589_p8, %p1583_p5 }
  0x33   :  { %1593 = shalt.err (!%p1590_p9)
}
  0x34   :  { %45 = dma.hbm_to_vmem [thread:$0]  %s1805_s2, 128, %s43_s10, [#allocation6]  }
  0x35   :  { %s1651_s30 = smov [#allocation8]   ;;  %s1594_s9 = scalar_lea.hbm %s1806_s3, 7680 }
  0x36   :  { %s51_s6 = sshll.u32 %s1651_s30, 4  ;;  %p1595_p10 = scmp.ne.s32.totalorder %s1806_s3, %s1594_s9  ;;  %s52_s6 = int_to_ptr.vmem [resolvable:$true] %s51_s6 }
  0x37   :  { %p1598_p11 = scmp.lt.u32.totalorder %s1594_s9, %s1806_s3 }
  0x39   :  { %p1600_p12 = pnand %p1598_p11, %p1595_p10 }
  0x3b   :  { %1603 = shalt.err (!%p1600_p12)
}
  0x3c   :  { %s1604_s15 = scalar_lea.vmem %s52_s6, 7680  ;;  %p1609_p0 = scmp.lt.s32.totalorder %s52_s6, %s52_s6 }
  0x3d   :  { %p1605_p13 = scmp.ne.s32.totalorder %s52_s6, %s1604_s15  ;;  %p1610_p1 = scmp.lt.s32.totalorder %s1604_s15, %s1604_s15 }
  0x3f   :  { %p1611_p2 = por %p1610_p1, %p1609_p0 }
  0x41   :  { %p1612_p3 = pnand %p1611_p2, %p1605_p13 }
  0x43   :  { %1615 = shalt.err (!%p1612_p3)
}
  0x44   :  { %s1652_s2 = smov 64   ;;  %s1653_s10 = smov 4  }
  0x45   :  { %57 = dma.hbm_to_vmem [thread:$0]  %s1806_s3, 7680, %s52_s6, [#allocation9], %s1652_s2, %s1652_s2, %s1653_s10  }
  0x46   :  { %1638 = dma.done.wait [#allocation3], 16  }
  0x47   :  { %1639 = vsyncadd [#allocation3], 4294967280 }
  0x48   :  { %1640 = dma.done.wait [#allocation6], 6272  }
  0x49   :  { %1641 = vsyncadd [#allocation6], 4294961024 }
  0x4a   :  { %1642 = dma.done.wait [#allocation9], 7680  }
  0x4b   :  { %1643 = vsyncadd [#allocation9], 4294959616  ;;  %v1654_v0 = vmov 0   ;;  %v74_v1 = vld [vmem:[#allocation5] sm:$0xff]  ;;  %v75_v3 = vld [vmem:[#allocation5 + $0x8] sm:$0xff]  ;;  %vm400_vm0 = vcmask 1044480  }
  0x4c   :  { %457 = vmatprep.mubr.bf16.mxu0 %v1654_v0  ;;  %498 = vmatprep.mubr.bf16.mxu1 %v1654_v0  ;;  %v78_v2 = vld [vmem:[#allocation5 + $0x20] sm:$0xff]  ;;  %v79_v5 = vld [vmem:[#allocation5 + $0x28] sm:$0xff]  ;;  %v76_v44 = vld [vmem:[#allocation5 + $0x10] sm:$0xff]  ;;  %vm396_vm1 = vcmask 736256   ;;  %vm1092_vm2 = vcmask 523264   ;;  %s1655_s18 = smov [#allocation10]  }
  0x4d   :  { %v1275_v4 = vcombine.high %v74_v1, %v78_v2  ;;  %v1274_v6 = vcombine.low %v74_v1, %v78_v2  ;;  %v82_v7 = vld [vmem:[#allocation5 + $0x40] sm:$0xff]  ;;  %v1277_v9 = vcombine.high %v75_v3, %v79_v5  ;;  %v1276_v10 = vcombine.low %v75_v3, %v79_v5  ;;  %v83_v12 = vld [vmem:[#allocation5 + $0x48] sm:$0xff]  ;;  %v80_v45 = vld [vmem:[#allocation5 + $0x30] sm:$0xff]  ;;  %s1263_s19 = sshll.u32 %s1655_s18, 4  ;;  %s1264_s19 = int_to_ptr.vmem [resolvable:$true] %s1263_s19 }
  0x4e   :  { %v86_v8 = vld [vmem:[#allocation5 + $0x60] sm:$0xff]  ;;  %v87_v13 = vld [vmem:[#allocation5 + $0x68] sm:$0xff]  ;;  %v77_v51 = vld [vmem:[#allocation5 + $0x18] sm:$0xff]  ;;  %v1279_v55 = vcombine.high %v76_v44, %v80_v45  ;;  %v1278_v62 = vcombine.low %v76_v44, %v80_v45  ;;  %p1621_p5 = scmp.lt.s32.totalorder %s1264_s19, %s1264_s19 }
  0x4f   :  { %v1283_v11 = vcombine.high %v82_v7, %v86_v8  ;;  %v90_v14 = vld [vmem:[#allocation5 + $0x80] sm:$0xff]  ;;  %425 = vmatprep.subr.bf16.mxu0 %v1275_v4  ;;  %v1285_v15 = vcombine.high %v83_v12, %v87_v13  ;;  %v91_v17 = vld [vmem:[#allocation5 + $0x88] sm:$0xff]  ;;  %466 = vmatprep.subr.bf16.mxu1 %v1277_v9  ;;  %v1282_v19 = vcombine.low %v82_v7, %v86_v8  ;;  %v81_v52 = vld [vmem:[#allocation5 + $0x38] sm:$0xff] }
  0x50   :  { %v94_v16 = vld [vmem:[#allocation5 + $0xa0] sm:$0xff]  ;;  %v95_v18 = vld [vmem:[#allocation5 + $0xa8] sm:$0xff]  ;;  %426 = vmatpush1.bf16.msra.mxu0 %v1274_v6  ;;  %467 = vmatpush1.bf16.msra.mxu1 %v1276_v10  ;;  %v1284_v20 = vcombine.low %v83_v12, %v87_v13  ;;  %v84_v53 = vld [vmem:[#allocation5 + $0x50] sm:$0xff]  ;;  %v1281_v59 = vcombine.high %v77_v51, %v81_v52  ;;  %v1280_v3 = vcombine.low %v77_v51, %v81_v52 }
  0x51   :  { %427 = vmatprep.subr.bf16.mxu0 %v1283_v11  ;;  %v1291_v21 = vcombine.high %v90_v14, %v94_v16  ;;  %468 = vmatprep.subr.bf16.mxu1 %v1285_v15  ;;  %v1293_v22 = vcombine.high %v91_v17, %v95_v18  ;;  %v98_v23 = vld [vmem:[#allocation5 + $0xc0] sm:$0xff]  ;;  %v99_v25 = vld [vmem:[#allocation5 + $0xc8] sm:$0xff]  ;;  %v1290_v27 = vcombine.low %v90_v14, %v94_v16  ;;  %v88_v56 = vld [vmem:[#allocation5 + $0x70] sm:$0xff] }
  0x52   :  { %v102_v24 = vld [vmem:[#allocation5 + $0xe0] sm:$0xff]  ;;  %v103_v26 = vld [vmem:[#allocation5 + $0xe8] sm:$0xff]  ;;  %v1292_v28 = vcombine.low %v91_v17, %v95_v18  ;;  %v1740_v58 = vld [vmem:[#allocation2] sm:$0x1]  ;;  %v1287_v1 = vcombine.high %v84_v53, %v88_v56  ;;  %v1286_v7 = vcombine.low %v84_v53, %v88_v56 }
  0x53   :  { %v1299_v29 = vcombine.high %v98_v23, %v102_v24  ;;  %v1301_v30 = vcombine.high %v99_v25, %v103_v26  ;;  %v106_v31 = vld [vmem:[#allocation5 + $0x100] sm:$0xff]  ;;  %v107_v33 = vld [vmem:[#allocation5 + $0x108] sm:$0xff]  ;;  %v1298_v35 = vcombine.low %v98_v23, %v102_v24  ;;  %v1300_v36 = vcombine.low %v99_v25, %v103_v26  ;;  %v85_v60 = vld [vmem:[#allocation5 + $0x58] sm:$0xff] }
  0x54   :  { %428 = vmatpush1.bf16.msra.mxu0 %v1282_v19  ;;  %469 = vmatpush1.bf16.msra.mxu1 %v1284_v20  ;;  %v110_v32 = vld [vmem:[#allocation5 + $0x120] sm:$0xff]  ;;  %v111_v34 = vld [vmem:[#allocation5 + $0x128] sm:$0xff]  ;;  %v89_v61 = vld [vmem:[#allocation5 + $0x78] sm:$0xff] }
  0x55   :  { %429 = vmatprep.subr.bf16.mxu0 %v1291_v21  ;;  %470 = vmatprep.subr.bf16.mxu1 %v1293_v22  ;;  %v1307_v37 = vcombine.high %v106_v31, %v110_v32  ;;  %v1309_v38 = vcombine.high %v107_v33, %v111_v34  ;;  %v114_v39 = vld [vmem:[#allocation5 + $0x140] sm:$0xff]  ;;  %v115_v41 = vld [vmem:[#allocation5 + $0x148] sm:$0xff]  ;;  %v1306_v43 = vcombine.low %v106_v31, %v110_v32  ;;  %v92_v63 = vld [vmem:[#allocation5 + $0x90] sm:$0xff] }
  0x56   :  { %v118_v40 = vld [vmem:[#allocation5 + $0x160] sm:$0x11]  ;;  %v119_v42 = vld [vmem:[#allocation5 + $0x168] sm:$0x11]  ;;  %v1308_v46 = vcombine.low %v107_v33, %v111_v34  ;;  %v96_v2 = vld [vmem:[#allocation5 + $0xb0] sm:$0xff]  ;;  %v1289_v4 = vcombine.high %v85_v60, %v89_v61  ;;  %v1288_v11 = vcombine.low %v85_v60, %v89_v61 }
  0x57   :  { %v1315_v47 = vcombine.high %v114_v39, %v118_v40  ;;  %v1314_v48 = vcombine.low %v114_v39, %v118_v40  ;;  %v1317_v49 = vcombine.high %v115_v41, %v119_v42  ;;  %v1316_v50 = vcombine.low %v115_v41, %v119_v42  ;;  %v93_v5 = vld [vmem:[#allocation5 + $0x98] sm:$0xff]  ;;  %v100_v8 = vld [vmem:[#allocation5 + $0xd0] sm:$0xff]  ;;  %v1468_v39 = vld [vmem:[#allocation8 + $0x40] sm:$0xff]  }
  0x58   :  { %430 = vmatpush1.bf16.msra.mxu0 %v1290_v27  ;;  %471 = vmatpush1.bf16.msra.mxu1 %v1292_v28  ;;  %v97_v6 = vld [vmem:[#allocation5 + $0xb8] sm:$0xff]  ;;  %v1295_v9 = vcombine.high %v92_v63, %v96_v2  ;;  %v104_v10 = vld [vmem:[#allocation5 + $0xf0] sm:$0xff]  ;;  %v1294_v17 = vcombine.low %v92_v63, %v96_v2  ;;  %v1469_v40 = vld [vmem:[#allocation8 + $0xc0] sm:$0xff]  }
  0x59   :  { %431 = vmatprep.subr.bf16.mxu0 %v1299_v29  ;;  %472 = vmatprep.subr.bf16.mxu1 %v1301_v30  ;;  %v402_v54 = vsel %vm400_vm0, %v1314_v48, 0  ;;  %v408_v57 = vsel %vm400_vm0, %v1316_v50, 0  ;;  %v1297_v12 = vcombine.high %v93_v5, %v97_v6  ;;  %v101_v13 = vld [vmem:[#allocation5 + $0xd8] sm:$0xff]  ;;  %v116_v14 = vld [vmem:[#allocation5 + $0x150] sm:$0xff]  ;;  %v1303_v21 = vcombine.high %v100_v8, %v104_v10  ;;  %v1470_v41 = vld [vmem:[#allocation8] sm:$0xff]  }
  0x5a   :  { %v120_v15 = vld [vmem:[#allocation5 + $0x170] sm:$0x11]  ;;  %v105_v16 = vld [vmem:[#allocation5 + $0xf8] sm:$0xff]  ;;  %v1296_v22 = vcombine.low %v93_v5, %v97_v6  ;;  %v1302_v27 = vcombine.low %v100_v8, %v104_v10  ;;  %v1471_v42 = vld [vmem:[#allocation8 + $0x80] sm:$0xff]  }
  0x5b   :  { %v108_v18 = vld [vmem:[#allocation5 + $0x110] sm:$0xff]  ;;  %v117_v20 = vld [vmem:[#allocation5 + $0x158] sm:$0xff]  ;;  %v1305_v24 = vcombine.high %v101_v13, %v105_v16  ;;  %v1318_v28 = vcombine.low %v116_v14, %v120_v15  ;;  %v1304_v31 = vcombine.low %v101_v13, %v105_v16  ;;  %v1480_v51 = vld [vmem:[#allocation8 + $0x58] sm:$0xff]  }
  0x5c   :  { %432 = vmatpush1.bf16.msra.mxu0 %v1298_v35  ;;  %473 = vmatpush1.bf16.msra.mxu1 %v1300_v36  ;;  %v112_v19 = vld [vmem:[#allocation5 + $0x130] sm:$0xff]  ;;  %v121_v23 = vld [vmem:[#allocation5 + $0x178] sm:$0x11]  ;;  %v1319_v36 = vcombine.high %v116_v14, %v120_v15  ;;  %v1481_v52 = vld [vmem:[#allocation8 + $0xd8] sm:$0xff]  }
  0x5d   :  { %433 = vmatprep.subr.bf16.mxu0 %v1307_v37  ;;  %474 = vmatprep.subr.bf16.mxu1 %v1309_v38  ;;  %v109_v25 = vld [vmem:[#allocation5 + $0x118] sm:$0xff]  ;;  %v1320_v29 = vcombine.low %v117_v20, %v121_v23  ;;  %v1311_v30 = vcombine.high %v108_v18, %v112_v19  ;;  %v1310_v33 = vcombine.low %v108_v18, %v112_v19  ;;  %v414_v34 = vsel %vm400_vm0, %v1318_v28, 0  ;;  %v1473_v44 = vld [vmem:[#allocation8 + $0xc8] sm:$0xff]   ;;  %v1482_v53 = vld [vmem:[#allocation8 + $0x18] sm:$0xff]  }
  0x5e   :  { %v113_v26 = vld [vmem:[#allocation5 + $0x138] sm:$0xff]  ;;  %v1321_v38 = vcombine.high %v117_v20, %v121_v23  ;;  %v1474_v45 = vld [vmem:[#allocation8 + $0x8] sm:$0xff]   ;;  %v1485_v56 = vld [vmem:[#allocation8 + $0xe0] sm:$0xff]  }
  0x5f   :  { %v1313_v32 = vcombine.high %v109_v25, %v113_v26  ;;  %v420_v35 = vsel %vm400_vm0, %v1320_v29, 0  ;;  %v1312_v37 = vcombine.low %v109_v25, %v113_v26  ;;  %v1477_v48 = vld [vmem:[#allocation8 + $0xd0] sm:$0xff]   ;;  %v1489_v60 = vld [vmem:[#allocation8 + $0xe8] sm:$0xff]   ;;  %v1497_v5 = vld [vmem:[#allocation8 + $0xf8] sm:$0xff]  }
  0x60   :  { %434 = vmatpush1.bf16.msra.mxu0 %v1306_v43  ;;  %475 = vmatpush1.bf16.msra.mxu1 %v1308_v46  ;;  %v1472_v43 = vld [vmem:[#allocation8 + $0x48] sm:$0xff]   ;;  %v1479_v50 = vld [vmem:[#allocation8 + $0x90] sm:$0xff]   ;;  %v1498_v6 = vld [vmem:[#allocation8 + $0x38] sm:$0xff]  }
  0x61   :  { %1322 = vmatprep.subr.msk.bf16.mxu0 %vm400_vm0, %v1315_v47  ;;  %1324 = vmatprep.subr.msk.bf16.mxu1 %vm400_vm0, %v1317_v49  ;;  %v1475_v46 = vld [vmem:[#allocation8 + $0x88] sm:$0xff]   ;;  %v1476_v47 = vld [vmem:[#allocation8 + $0x50] sm:$0xff]   ;;  %v1500_v8 = vld [vmem:[#allocation8 + $0x140] sm:$0xff]  }
  0x62   :  { %v1478_v49 = vld [vmem:[#allocation8 + $0x10] sm:$0xff]   ;;  %v1490_v61 = vld [vmem:[#allocation8 + $0x28] sm:$0xff]   ;;  %v1762_v14 = vld [vmem:[#allocation7] sm:$0xff] }
  0x63   :  { %v1492_v63 = vld [vmem:[#allocation8 + $0x70] sm:$0xff]  }
  0x64   :  { %436 = vmatpush1.bf16.msra.mxu0 %v402_v54  ;;  %477 = vmatpush1.bf16.msra.mxu1 %v408_v57  ;;  %v1483_v54 = vld [vmem:[#allocation8 + $0x98] sm:$0xff]   ;;  %v1486_v57 = vld [vmem:[#allocation8 + $0x20] sm:$0xff]   ;;  %v1494_v2 = vld [vmem:[#allocation8 + $0x30] sm:$0xff]  }
  0x65   :  { %507 = vmatprep.subr.bf16.mxu0 %v1279_v55  ;;  %548 = vmatprep.subr.bf16.mxu1 %v1281_v59  ;;  %v1484_v55 = vld [vmem:[#allocation8 + $0x60] sm:$0xff]   ;;  %v1488_v59 = vld [vmem:[#allocation8 + $0x68] sm:$0xff]  }
  0x67   :  { %1323 = vmatmul.mubr.msk.bf16.vlgmr.msra.gmra.mrb[0].mxu0 %vm396_vm1, %v1740_v58  ;;  %1325 = vmatmul.mubr.msk.bf16.vlgmr.msra.gmra.mrb[0].mxu1 %vm396_vm1, %v1740_v58 }
  0x68   :  { %508 = vmatpush1.bf16.msra.mxu0 %v1278_v62  ;;  %549 = vmatpush1.bf16.msra.mxu1 %v1280_v3  ;;  %v1491_v62 = vld [vmem:[#allocation8 + $0xa8] sm:$0xff]   ;;  %v1495_v3 = vld [vmem:[#allocation8 + $0xb0] sm:$0xff]  }
  0x69   :  { %509 = vmatprep.subr.bf16.mxu0 %v1287_v1  ;;  %550 = vmatprep.subr.bf16.mxu1 %v1289_v4  ;;  %v1493_v1 = vld [vmem:[#allocation8 + $0xf0] sm:$0xff]   ;;  %v1496_v4 = vld [vmem:[#allocation8 + $0x78] sm:$0xff]  }
  0x6a   :  { %539 = vmatprep.mubr.bf16.mxu0 %v1654_v0  ;;  %580 = vmatprep.mubr.bf16.mxu1 %v1654_v0 }
  0x6c   :  { %510 = vmatpush1.bf16.msra.mxu0 %v1286_v7  ;;  %551 = vmatpush1.bf16.msra.mxu1 %v1288_v11  ;;  %v1499_v7 = vld [vmem:[#allocation8 + $0xb8] sm:$0xff]  }
  0x6d   :  { %511 = vmatprep.subr.bf16.mxu0 %v1295_v9  ;;  %552 = vmatprep.subr.bf16.mxu1 %v1297_v12  ;;  %v124_v9 = vlaneseq }
  0x6f   :  { %v1757_v10 = vshrl.u32 %v124_v9, 7 }
  0x70   :  { %512 = vmatpush1.bf16.msra.mxu0 %v1294_v17  ;;  %553 = vmatpush1.bf16.msra.mxu1 %v1296_v22 }
  0x71   :  { %513 = vmatprep.subr.bf16.mxu0 %v1303_v21  ;;  %554 = vmatprep.subr.bf16.mxu1 %v1305_v24  ;;  %v126_v11 = vsub.s32 0, %v1757_v10  ;;  %v134_v12 = vsub.s32 2, %v1757_v10  ;;  %v130_v13 = vsub.s32 1, %v1757_v10  ;;  %v138_v15 = vsub.s32 3, %v1757_v10 }
  0x73   :  { %v127_v16 = vrot.slane %v1762_v14, %v126_v11  ;;  %v135_v17 = vrot.slane %v1762_v14, %v134_v12  ;;  %v131_v18 = vrot.slane %v1762_v14, %v130_v13  ;;  %v139_v19 = vrot.slane %v1762_v14, %v138_v15 }
  0x74   :  { %514 = vmatpush1.bf16.msra.mxu0 %v1302_v27  ;;  %555 = vmatpush1.bf16.msra.mxu1 %v1304_v31 }
  0x75   :  { %515 = vmatprep.subr.bf16.mxu0 %v1311_v30  ;;  %556 = vmatprep.subr.bf16.mxu1 %v1313_v32 }
  0x78   :  { %516 = vmatpush1.bf16.msra.mxu0 %v1310_v33  ;;  %557 = vmatpush1.bf16.msra.mxu1 %v1312_v37 }
  0x79   :  { %1326 = vmatprep.subr.msk.bf16.mxu0 %vm400_vm0, %v1319_v36  ;;  %1328 = vmatprep.subr.msk.bf16.mxu1 %vm400_vm0, %v1321_v38  ;;  %v1501_v38 = vld [vmem:[#allocation8 + $0x100] sm:$0xff]  }
  0x7c   :  { %518 = vmatpush1.bf16.msra.mxu0 %v414_v34  ;;  %559 = vmatpush1.bf16.msra.mxu1 %v420_v35 }
  0x7d   :  { %1392 = vmatprep.subr.bf16.mxu0 %v1468_v39  ;;  %1414 = vmatprep.subr.bf16.mxu1 %v1469_v40  ;;  %v1502_v40 = vld [vmem:[#allocation8 + $0x180] sm:$0xff]  }
  0x7f   :  { %1327 = vmatmul.mubr.msk.bf16.vlgmr.msra.gmra.mrb[4].mxu0 %vm396_vm1, %v1740_v58  ;;  %1329 = vmatmul.mubr.msk.bf16.vlgmr.msra.gmra.mrb[4].mxu1 %vm396_vm1, %v1740_v58  ;;  %v1487_v58 = vld [vmem:[#allocation8 + $0xa0] sm:$0xff]  }
  0x80   :  { %1393 = vmatpush3.bf16.msra.mxu0 %v1470_v41  ;;  %1415 = vmatpush3.bf16.msra.mxu1 %v1471_v42  ;;  %v1503_v41 = vld [vmem:[#allocation8 + $0x148] sm:$0xff]  }
  0x81   :  { %1394 = vmatprep.subr.bf16.mxu0 %v1472_v43  ;;  %1416 = vmatprep.subr.bf16.mxu1 %v1473_v44  ;;  %v1504_v43 = vld [vmem:[#allocation8 + $0x108] sm:$0xff]  }
  0x82   :  { %v1505_v44 = vld [vmem:[#allocation8 + $0x188] sm:$0xff]  }
  0x84   :  { %1395 = vmatpush3.bf16.msra.mxu0 %v1474_v45  ;;  %1417 = vmatpush3.bf16.msra.mxu1 %v1475_v46  ;;  %v1506_v45 = vld [vmem:[#allocation8 + $0x150] sm:$0xff]  }
  0x85   :  { %1396 = vmatprep.subr.bf16.mxu0 %v1476_v47  ;;  %1418 = vmatprep.subr.bf16.mxu1 %v1477_v48  ;;  %v1507_v46 = vld [vmem:[#allocation8 + $0x110] sm:$0xff]   ;;  %v1509_v48 = vld [vmem:[#allocation8 + $0x158] sm:$0xff]  }
  0x86   :  { %v1508_v47 = vld [vmem:[#allocation8 + $0x190] sm:$0xff]  }
  0x88   :  { %1397 = vmatpush3.bf16.msra.mxu0 %v1478_v49  ;;  %1419 = vmatpush3.bf16.msra.mxu1 %v1479_v50  ;;  %v1510_v49 = vld [vmem:[#allocation8 + $0x118] sm:$0xff]   ;;  %v146_v50 = vsub.s32 5, %v1757_v10 }
  0x89   :  { %1398 = vmatprep.subr.bf16.mxu0 %v1480_v51  ;;  %1420 = vmatprep.subr.bf16.mxu1 %v1481_v52  ;;  %v1511_v51 = vld [vmem:[#allocation8 + $0x198] sm:$0xff]   ;;  %v1512_v52 = vld [vmem:[#allocation8 + $0x160] sm:$0xff]  }
  0x8c   :  { %1399 = vmatpush3.bf16.msra.mxu0 %v1482_v53  ;;  %1421 = vmatpush3.bf16.msra.mxu1 %v1483_v54  ;;  %v154_v53 = vsub.s32 7, %v1757_v10  ;;  %v142_v54 = vsub.s32 4, %v1757_v10 }
  0x8d   :  { %1400 = vmatprep.subr.bf16.mxu0 %v1484_v55  ;;  %1422 = vmatprep.subr.bf16.mxu1 %v1485_v56  ;;  %v1513_v55 = vld [vmem:[#allocation8 + $0x120] sm:$0xff]   ;;  %v147_v56 = vrot.slane %v1762_v14, %v146_v50 }
  0x90   :  { %1401 = vmatpush3.bf16.msra.mxu0 %v1486_v57  ;;  %1423 = vmatpush3.bf16.msra.mxu1 %v1487_v58  ;;  %v1514_v57 = vld [vmem:[#allocation8 + $0x1a0] sm:$0xff]   ;;  %v1515_v58 = vld [vmem:[#allocation8 + $0x168] sm:$0xff]  }
  0x91   :  { %1402 = vmatprep.subr.bf16.mxu0 %v1488_v59  ;;  %1424 = vmatprep.subr.bf16.mxu1 %v1489_v60  ;;  %v155_v59 = vrot.slane %v1762_v14, %v154_v53 }
  0x94   :  { %1403 = vmatpush3.bf16.msra.mxu0 %v1490_v61  ;;  %1425 = vmatpush3.bf16.msra.mxu1 %v1491_v62  ;;  %v143_v61 = vrot.slane %v1762_v14, %v142_v54 }
  0x95   :  { %1404 = vmatprep.subr.bf16.mxu0 %v1492_v63  ;;  %1426 = vmatprep.subr.bf16.mxu1 %v1493_v1  ;;  %v1516_v1 = vld [vmem:[#allocation8 + $0x128] sm:$0xff]  }
  0x98   :  { %1405 = vmatpush3.bf16.msra.mxu0 %v1494_v2  ;;  %1427 = vmatpush3.bf16.msra.mxu1 %v1495_v3 }
  0x99   :  { %1406 = vmatprep.subr.bf16.mxu0 %v1496_v4  ;;  %1428 = vmatprep.subr.bf16.mxu1 %v1497_v5  ;;  %v1517_v5 = vld [vmem:[#allocation8 + $0x1a8] sm:$0xff]  }
  0x9c   :  { %1407 = vmatpush3.bf16.msra.mxu0 %v1498_v6  ;;  %1429 = vmatpush3.bf16.msra.mxu1 %v1499_v7  ;;  %v1518_v6 = vld [vmem:[#allocation8 + $0x170] sm:$0xff]  }
  0x9d   :  { %1216 = vmatprep.subr.bf16.mxu1 %v1654_v0  ;;  %1436 = vmatprep.subr.bf16.mxu0 %v1500_v8 }
 0x13a   :  { %v459_v20 = vpop.f32.mrb[0].mxu0  ;;  %v500_v22 = vpop.f32.mrb[0].mxu1 }
 0x13b   :  { %v460_v21 = vadd.f32 %v459_v20, %v127_v16  ;;  %v461_v23 = vpop.f32.mrb[1].mxu0  ;;  %v501_v24 = vadd.f32 %v500_v22, %v135_v17  ;;  %v502_v26 = vpop.f32.mrb[1].mxu1  ;;  %v1519_v17 = vld [vmem:[#allocation8 + $0x130] sm:$0xff]   ;;  %v1522_v22 = vld [vmem:[#allocation8 + $0x138] sm:$0xff]  }
 0x13c   :  { %v462_v25 = vadd.f32 %v461_v23, %v131_v18  ;;  %v463_v27 = vpop.f32.mrb[2].mxu0  ;;  %v503_v29 = vadd.f32 %v502_v26, %v139_v19  ;;  %v504_v30 = vpop.f32.mrb[2].mxu1  ;;  %v1520_v18 = vld [vmem:[#allocation8 + $0x1b0] sm:$0xff]   ;;  %v1521_v19 = vld [vmem:[#allocation8 + $0x178] sm:$0xff]   ;;  %v150_v26 = vsub.s32 6, %v1757_v10 }
 0x13d   :  { %v589_v28 = vmax.f32 %v460_v21, 0.0  ;;  %v464_v31 = vpop.f32.mrb[3].mxu0  ;;  %v591_v32 = vmax.f32 %v501_v24, 0.0  ;;  %v505_v34 = vpop.f32.mrb[3].mxu1  ;;  %v1523_v23 = vld [vmem:[#allocation8 + $0x1b8] sm:$0xff]   ;;  %v1525_v27 = vld [vmem:[#allocation8 + $0x1c8] sm:$0xff]  }
 0x13e   :  { %v590_v33 = vmax.f32 %v462_v25, 0.0  ;;  %v592_v36 = vmax.f32 %v503_v29, 0.0  ;;  %v1524_v25 = vld [vmem:[#allocation8 + $0x1c0] sm:$0xff]   ;;  %v1526_v29 = vld [vmem:[#allocation8 + $0x1d0] sm:$0xff]   ;;  %v1527_v31 = vld [vmem:[#allocation8 + $0x1d8] sm:$0xff]  }
 0x13f   :  { %v597_v35 = vpack.c.bf16 %v589_v28, %v589_v28  ;;  %v599_v42 = vpack.c.bf16 %v591_v32, %v591_v32  ;;  %v151_v28 = vrot.slane %v1762_v14, %v150_v26  ;;  %v1330_v14 = vld [vmem:[%s1807_s4] ss:$0 sm:$0xff]  ;;  %s1616_s4 = scalar_lea.vmem %s1264_s19, 32 }
 0x140   :  { %v598_v37 = vpack.c.bf16 %v590_v33, %v590_v33  ;;  %v600_v39 = vpack.c.bf16 %v592_v36, %v592_v36  ;;  %p1617_p4 = scmp.ne.s32.totalorder %s1264_s19, %s1616_s4  ;;  %p1622_p6 = scmp.lt.s32.totalorder %s1616_s4, %s1616_s4 }
 0x142   :  { %1128 = vmatprep.mubr.bf16.mxu0 %v598_v37  ;;  %1168 = vmatprep.mubr.bf16.mxu1 %v600_v39  ;;  %p1623_p7 = por %p1622_p6, %p1621_p5 }
 0x143   :  { %1129 = vmatmul.mubr.bf16.vlgmr.msra.gmra.mrb[8].mxu0 %v597_v35  ;;  %1169 = vmatmul.mubr.bf16.vlgmr.msra.gmra.mrb[8].mxu1 %v599_v42 }
 0x144   :  { %1437 = vmatpush3.bf16.msra.mxu0 %v1501_v38  ;;  %1217 = vmatpush1.bf16.msra.mxu1 %v1502_v40  ;;  %p1624_p8 = pnand %p1623_p7, %p1617_p4 }
 0x145   :  { %1438 = vmatprep.subr.bf16.mxu0 %v1503_v41  ;;  %1218 = vmatprep.subr.bf16.mxu1 %v1654_v0 }
 0x148   :  { %1439 = vmatpush3.bf16.msra.mxu0 %v1504_v43  ;;  %1219 = vmatpush1.bf16.msra.mxu1 %v1505_v44 }
 0x149   :  { %1440 = vmatprep.subr.bf16.mxu0 %v1506_v45  ;;  %1220 = vmatprep.subr.bf16.mxu1 %v1654_v0 }
 0x14c   :  { %1441 = vmatpush3.bf16.msra.mxu0 %v1507_v46  ;;  %1221 = vmatpush1.bf16.msra.mxu1 %v1508_v47 }
 0x14d   :  { %1442 = vmatprep.subr.bf16.mxu0 %v1509_v48  ;;  %1222 = vmatprep.subr.bf16.mxu1 %v1654_v0 }
 0x150   :  { %1443 = vmatpush3.bf16.msra.mxu0 %v1510_v49  ;;  %1223 = vmatpush1.bf16.msra.mxu1 %v1511_v51 }
 0x151   :  { %1444 = vmatprep.subr.bf16.mxu0 %v1512_v52  ;;  %1224 = vmatprep.subr.bf16.mxu1 %v1654_v0 }
 0x152   :  { %v541_v60 = vpop.f32.mrb[4].mxu0  ;;  %v582_v63 = vpop.f32.mrb[4].mxu1 }
 0x153   :  { %v543_v62 = vpop.f32.mrb[5].mxu0  ;;  %v584_v4 = vpop.f32.mrb[5].mxu1  ;;  %v542_v13 = vadd.f32 %v541_v60, %v143_v61  ;;  %v583_v30 = vadd.f32 %v582_v63, %v151_v28 }
 0x154   :  { %1445 = vmatpush3.bf16.msra.mxu0 %v1513_v55  ;;  %v544_v2 = vadd.f32 %v543_v62, %v147_v56  ;;  %v545_v3 = vpop.f32.mrb[6].mxu0  ;;  %1225 = vmatpush1.bf16.msra.mxu1 %v1514_v57  ;;  %v585_v8 = vadd.f32 %v584_v4, %v155_v59  ;;  %v586_v9 = vpop.f32.mrb[6].mxu1 }
 0x155   :  { %1446 = vmatprep.subr.bf16.mxu0 %v1515_v58  ;;  %v546_v7 = vpop.f32.mrb[7].mxu0  ;;  %1226 = vmatprep.subr.bf16.mxu1 %v1654_v0  ;;  %v587_v12 = vpop.f32.mrb[7].mxu1  ;;  %v593_v21 = vmax.f32 %v542_v13, 0.0  ;;  %v595_v32 = vmax.f32 %v583_v30, 0.0 }
 0x156   :  { %v594_v11 = vmax.f32 %v544_v2, 0.0  ;;  %v596_v15 = vmax.f32 %v585_v8, 0.0 }
 0x157   :  { %v601_v24 = vpack.c.bf16 %v593_v21, %v593_v21  ;;  %v603_v33 = vpack.c.bf16 %v595_v32, %v595_v32 }
 0x158   :  { %1447 = vmatpush3.bf16.msra.mxu0 %v1516_v1  ;;  %v602_v16 = vpack.c.bf16 %v594_v11, %v594_v11  ;;  %1227 = vmatpush1.bf16.msra.mxu1 %v1517_v5  ;;  %v604_v20 = vpack.c.bf16 %v596_v15, %v596_v15 }
 0x159   :  { %1448 = vmatprep.subr.bf16.mxu0 %v1518_v6  ;;  %1228 = vmatprep.subr.bf16.mxu1 %v1654_v0 }
 0x15a   :  { %1208 = vmatprep.mubr.bf16.mxu0 %v602_v16  ;;  %1391 = vmatprep.mubr.msk.bf16.mxu1 %vm1092_vm2, %v604_v20 }
 0x15c   :  { %1449 = vmatpush3.bf16.msra.mxu0 %v1519_v17  ;;  %1229 = vmatpush1.bf16.msra.mxu1 %v1520_v18 }
 0x15d   :  { %1450 = vmatprep.subr.bf16.mxu0 %v1521_v19  ;;  %1230 = vmatprep.subr.bf16.mxu1 %v1654_v0 }
 0x160   :  { %1451 = vmatpush3.bf16.msra.mxu0 %v1522_v22  ;;  %1231 = vmatpush1.bf16.msra.mxu1 %v1523_v23 }
 0x161   :  { %1232 = vmatprep.subr.bf16.mxu1 %v1654_v0 }
 0x163   :  { %1209 = vmatmul.mubr.bf16.vlgmr.msra.gmra.mrb[12].mxu0 %v601_v24 }
 0x164   :  { %1233 = vmatpush1.bf16.msra.mxu1 %v1524_v25 }
 0x165   :  { %1234 = vmatprep.subr.bf16.mxu1 %v1654_v0 }
 0x168   :  { %1235 = vmatpush1.bf16.msra.mxu1 %v1525_v27 }
 0x169   :  { %1236 = vmatprep.subr.bf16.mxu1 %v1654_v0 }
 0x16c   :  { %1237 = vmatpush1.bf16.msra.mxu1 %v1526_v29 }
 0x16d   :  { %1238 = vmatprep.subr.bf16.mxu1 %v1654_v0 }
 0x170   :  { %1239 = vmatpush1.bf16.msra.mxu1 %v1527_v31 }
 0x173   :  { %1249 = vmatmul.mubr.bf16.vlgmr.msra.gmra.mrb[12].mxu1 %v603_v33 }
 0x216   :  { %v1408_v10 = vpop.f32.mrb[8].mxu0  ;;  %v1430_v34 = vpop.f32.mrb[8].mxu1 }
 0x217   :  { %v1409_v35 = vpop.f32.mrb[9].mxu0  ;;  %v1431_v37 = vpop.f32.mrb[9].mxu1 }
 0x218   :  { %v1410_v36 = vadd.f32 %v1409_v35, %v1408_v10  ;;  %v1411_v38 = vpop.f32.mrb[10].mxu0  ;;  %v1432_v39 = vadd.f32 %v1431_v37, %v1430_v34  ;;  %v1433_v40 = vpop.f32.mrb[10].mxu1 }
 0x219   :  { %v1412_v41 = vpop.f32.mrb[11].mxu0  ;;  %v1434_v43 = vpop.f32.mrb[11].mxu1 }
 0x21a   :  { %v1131_v42 = vadd.f32 %v1410_v36, %v1330_v14 }
 0x21c   :  { %v1171_v44 = vadd.f32 %v1432_v39, %v1131_v42 }
 0x236   :  { %v1452_v0 = vpop.f32.mrb[12].mxu0 }
 0x237   :  { %v1453_v45 = vpop.f32.mrb[13].mxu0 }
 0x238   :  { %v1454_v46 = vadd.f32 %v1453_v45, %v1452_v0  ;;  %v1455_v47 = vpop.f32.mrb[14].mxu0 }
 0x239   :  { %v1456_v48 = vpop.f32.mrb[15].mxu0 }
 0x23a   :  { %v1211_v49 = vadd.f32 %v1454_v46, %v1171_v44 }
 0x246   :  { %v1250_v50 = vpop.f32.mrb[12].mxu1 }
 0x247   :  { %v1251_v51 = vadd.f32 %v1250_v50, %v1211_v49  ;;  %v1252_v52 = vpop.f32.mrb[13].mxu1 }
 0x248   :  { %v1253_v53 = vpop.f32.mrb[14].mxu1 }
 0x249   :  { %1256 = vst [vmem:[#allocation10] sm:$0x3] %v1251_v51  ;;  %v1254_v54 = vpop.f32.mrb[15].mxu1 }
 0x24a   :  { %1627 = shalt.err (!%p1624_p8)
}
 0x24b   :  { %s1628_s22 = scalar_lea.hbm %s1808_s5, 32 }
 0x24c   :  { %p1629_p9 = scmp.ne.s32.totalorder %s1808_s5, %s1628_s22  ;;  %p1632_p10 = scmp.lt.u32.totalorder %s1628_s22, %s1808_s5 }
 0x24e   :  { %p1634_p11 = pnand %p1632_p10, %p1629_p9 }
 0x250   :  { %1637 = shalt.err (!%p1634_p11)
}
 0x251   :  { %1266 = dma.vmem_to_hbm [thread:$0]  %s1264_s19, 32, %s1808_s5, [#allocation4]  }
 0x252   :  { %1644 = dma.done.wait [#allocation4], 32  }
 0x253   :  { %1645 = vsyncadd [#allocation4], 4294967264 }
 0x254   :  { %1270 = vsyncpa [#allocation3], 1 }
 0x255   :  { %1271 = vsyncpa [#allocation6], 1 }
 0x256   :  { %1272 = vsyncpa [#allocation9], 1 }
 0x257   :  { %1273 = vsyncpa [#allocation4], 1 }

</bundles_post_ra>
